<compile_context>
chip_gen: v5e
topology: v5e:2x2
jax: 0.10.0
libtpu: 0.0.40
codegen_flags: <defaults>
</compile_context>

<pallas_src>
import jax
import jax.numpy as jnp
from jax.experimental import pallas as pl
from jax.experimental.pallas import tpu as pltpu


def _masked_gru_kernel(x_ref, mu_ref, dec_ref,
                       wir_ref, wiz_ref, win_ref,
                       whr_ref, whz_ref, whn_ref,
                       bir_ref, biz_ref, bin_ref,
                       wfc_ref, bfc_ref,
                       hs_ref, logits_ref):
    """Single-invocation kernel: whole sequence resident in VMEM.

    x_ref   : (S, B, I)     raw features, time-major
    mu_ref  : (L, S, B, H)  precomputed  x @ W_mu + b_mu
    dec_ref : (L, S, B, H)  precomputed  exp(-(d @ W_gamma + b_gamma) * m)
    w??_ref : (L, 1, H)     diagonals of the identity-masked gate weights
    b??_ref : (L, 1, H)     gate biases
    wfc_ref : (H, C), bfc_ref : (1, C)
    hs_ref  : (S, B, H)     all hidden states (output)
    logits_ref : (B, C)     final FC head (output)
    """
    S, B, _ = x_ref.shape
    L = mu_ref.shape[0]
    H = hs_ref.shape[2]

    # Loop-invariant weight/bias loads, broadcast once (outside the time loop).
    def bcast(ref):
        return [jnp.broadcast_to(ref[l], (B, H)) for l in range(L)]

    wir, wiz, win = bcast(wir_ref), bcast(wiz_ref), bcast(win_ref)
    whr, whz, whn = bcast(whr_ref), bcast(whz_ref), bcast(whn_ref)
    bir, biz, bin_ = bcast(bir_ref), bcast(biz_ref), bcast(bin_ref)
    mu_l = [mu_ref.at[l] for l in range(L)]     # static views: zero runtime cost
    dec_l = [dec_ref.at[l] for l in range(L)]

    def step(t, h):
        x_t = x_ref[t]                                   # (B, I) == (B, H)
        for l in range(L):
            # Diagonal masked weights -> elementwise multiplies (VPU), no MXU.
            r = jax.nn.sigmoid(x_t * wir[l] + bir[l] + h * whr[l])
            z = jax.nn.sigmoid(x_t * wiz[l] + biz[l] + h * whz[l])
            n = jnp.tanh(x_t * win[l] + bin_[l] + (h * r) * whn[l])
            h_new = (1.0 - z) * h + z * n
            mu = mu_l[l][t]
            h = mu + (h_new - mu) * dec_l[l][t]
        hs_ref[t] = h          # VMEM-resident slab; flushed to HBM once at end
        return h

    h_last = jax.lax.fori_loop(0, S, step, jnp.zeros((B, H), jnp.float32),
                               unroll=(S <= 32))

    logits_ref[...] = (
        jnp.dot(h_last, wfc_ref[...], preferred_element_type=jnp.float32)
        + bfc_ref[...])


def masked_gru_forward(x, delta_t, m_t, params):
    """x, delta_t, m_t: (batch, seq_len, input_size) float32.

    Returns (logits (B, num_classes), all_hidden_states (B, S, H)).
    """
    B, S, I = x.shape
    L, _, H = params["wir"].shape
    C = params["wfc"].shape[1]

    # Time-major.
    xt = jnp.transpose(x, (1, 0, 2))
    dt = jnp.transpose(delta_t, (1, 0, 2))
    mt = jnp.transpose(m_t, (1, 0, 2))

    # --- h-independent projections hoisted off the serial recurrence --------
    # One batched matmul per layer over the full sequence (MXU-friendly),
    # fed to the kernel as time-major slabs.
    mu_all = jnp.einsum('sbi,lih->lsbh', xt, params["wmu"]) + params["bmu"][:, None]
    gamma = jnp.einsum('sbi,lih->lsbh', dt, params["wg"]) + params["bg"][:, None]
    dec_all = jnp.exp(-gamma * mt[None])

    # Identity-masked weights are diagonal by construction -> pass diagonals.
    def diag(w):   # (L, H, H) -> (L, 1, H)
        return jnp.diagonal(w, axis1=1, axis2=2)[:, None, :]

    args = [xt, mu_all, dec_all,
            diag(params["wir"]), diag(params["wiz"]), diag(params["win"]),
            diag(params["whr"]), diag(params["whz"]), diag(params["whn"]),
            params["bir"], params["biz"], params["bin"],
            params["wfc"], params["bfc"]]

    def full_spec(a):
        nd = a.ndim
        return pl.BlockSpec(a.shape, lambda i, nd=nd: (0,) * nd)

    hs, logits = pl.pallas_call(
        _masked_gru_kernel,
        grid=(1,),   # recurrence is sequential in time; one resident step
        in_specs=[full_spec(a) for a in args],
        out_specs=[pl.BlockSpec((S, B, H), lambda i: (0, 0, 0)),
                   pl.BlockSpec((B, C), lambda i: (0, 0))],
        out_shape=(jax.ShapeDtypeStruct((S, B, H), jnp.float32),
                   jax.ShapeDtypeStruct((B, C), jnp.float32)),
        compiler_params=pltpu.CompilerParams(
            dimension_semantics=("arbitrary",)),
    )(*args)

    all_hidden = jnp.transpose(hs, (1, 0, 2))  # (B, S, H)
    return logits, all_hidden


def init_params(key, input_size, hidden_size, num_classes, num_layers):
    """Deterministic init mimicking torch.nn.Linear (U(-1/sqrt(fan_in), +)),
    with the identity mask applied to Wir/Wiz/Win/Whr/Whz/Whn (diagonal)."""
    assert input_size == hidden_size, "apply_mask requires input_size == hidden_size"
    H, I, L, C = hidden_size, input_size, num_layers, num_classes
    keys = iter(jax.random.split(key, num_layers * 16 + 4))
    eye = jnp.eye(H, dtype=jnp.float32)

    def u(shape, fan_in):
        b = 1.0 / float(fan_in) ** 0.5
        return jax.random.uniform(next(keys), shape, jnp.float32, -b, b)

    names = ["wir", "whr", "bir", "wiz", "whz", "biz",
             "win", "whn", "bin", "wmu", "bmu", "wg", "bg"]
    acc = {n: [] for n in names}
    for l in range(L):
        in_sz = I if l == 0 else H  # equal here, kept for clarity
        # masked (diagonal) gate weights, torch layout (out, in), then transposed.
        acc["wir"].append((u((H, in_sz), in_sz) * eye).T)
        acc["bir"].append(u((1, H), in_sz))
        acc["wiz"].append((u((H, in_sz), in_sz) * eye).T)
        acc["biz"].append(u((1, H), in_sz))
        acc["win"].append((u((H, in_sz), in_sz) * eye).T)
        acc["bin"].append(u((1, H), in_sz))
        acc["whr"].append((u((H, H), H) * eye).T)
        acc["whz"].append((u((H, H), H) * eye).T)
        acc["whn"].append((u((H, H), H) * eye).T)
        # unmasked decay/baseline projections
        acc["wmu"].append(u((H, in_sz), in_sz).T)
        acc["bmu"].append(u((1, H), in_sz))
        acc["wg"].append(u((H, in_sz), in_sz).T)
        acc["bg"].append(u((1, H), in_sz))
    params = {k: jnp.stack(v) for k, v in acc.items()}
    params["wfc"] = u((C, H), H).T        # (H, C)
    params["bfc"] = u((1, C), H)          # (1, C)
    return params


def masked_gru_reference(x, delta_t, m_t, params):
    """Pure-JAX reference matching the PyTorch forward (full matmuls)."""
    B, S, _ = x.shape
    L, _, H = params["wir"].shape
    h = jnp.zeros((B, H), jnp.float32)
    hs = []
    for t in range(S):
        xt, dt, mt = x[:, t], delta_t[:, t], m_t[:, t]
        for l in range(L):
            r = jax.nn.sigmoid(xt @ params["wir"][l] + params["bir"][l]
                               + h @ params["whr"][l])
            z = jax.nn.sigmoid(xt @ params["wiz"][l] + params["biz"][l]
                               + h @ params["whz"][l])
            n = jnp.tanh(xt @ params["win"][l] + params["bin"][l]
                         + (h * r) @ params["whn"][l])
            h_new = (1.0 - z) * h + z * n
            mu = xt @ params["wmu"][l] + params["bmu"][l]
            g = dt @ params["wg"][l] + params["bg"][l]
            h = mu + (h_new - mu) * jnp.exp(-g * mt)
        hs.append(h)
    all_h = jnp.stack(hs, axis=1)
    logits = h @ params["wfc"] + params["bfc"]
    return logits, all_h


if __name__ == "__main__":
    batch, seq_len = 2, 8
    input_size = hidden_size = 32   # apply_mask forces input_size == hidden_size
    num_classes, num_layers = 2, 1

    key = jax.random.PRNGKey(0)
    k_x, k_d, k_m, k_p = jax.random.split(key, 4)

    x = jax.random.normal(k_x, (batch, seq_len, input_size), jnp.float32)
    delta_t = jax.random.uniform(k_d, (batch, seq_len, input_size), jnp.float32,
                                 0.0, 2.0)
    m_t = jax.random.bernoulli(k_m, 0.7,
                               (batch, seq_len, input_size)).astype(jnp.float32)

    params = init_params(k_p, input_size, hidden_size, num_classes, num_layers)

    logits, all_hidden = masked_gru_forward(x, delta_t, m_t, params)
    jax.block_until_ready((logits, all_hidden))

    ref_logits, ref_hidden = masked_gru_reference(x, delta_t, m_t, params)
    assert logits.shape == (batch, num_classes)
    assert all_hidden.shape == (batch, seq_len, hidden_size)
    assert jnp.allclose(logits, ref_logits, rtol=1e-5, atol=1e-5)
    assert jnp.allclose(all_hidden, ref_hidden, rtol=1e-5, atol=1e-5)

    print("KERNEL_OK")
</pallas_src>

<mosaic_0001>
module attributes {stable_mosaic.version = 11 : i64} {
  func.func @_masked_gru_kernel(%arg0: i32, %arg1: memref<8x2x32xf32, #tpu.memory_space<vmem>>, %arg2: memref<1x8x2x32xf32, #tpu.memory_space<vmem>>, %arg3: memref<1x8x2x32xf32, #tpu.memory_space<vmem>>, %arg4: memref<1x1x32xf32, #tpu.memory_space<vmem>>, %arg5: memref<1x1x32xf32, #tpu.memory_space<vmem>>, %arg6: memref<1x1x32xf32, #tpu.memory_space<vmem>>, %arg7: memref<1x1x32xf32, #tpu.memory_space<vmem>>, %arg8: memref<1x1x32xf32, #tpu.memory_space<vmem>>, %arg9: memref<1x1x32xf32, #tpu.memory_space<vmem>>, %arg10: memref<1x1x32xf32, #tpu.memory_space<vmem>>, %arg11: memref<1x1x32xf32, #tpu.memory_space<vmem>>, %arg12: memref<1x1x32xf32, #tpu.memory_space<vmem>>, %arg13: memref<32x2xf32, #tpu.memory_space<vmem>>, %arg14: memref<1x2xf32, #tpu.memory_space<vmem>>, %arg15: memref<8x2x32xf32, #tpu.memory_space<vmem>>, %arg16: memref<2x2xf32, #tpu.memory_space<vmem>>) attributes {dimension_semantics = [#tpu.dimension_semantics<arbitrary>], iteration_bounds = array<i64: 1>, scalar_prefetch = 0 : i64, scratch_operands = 0 : i64, tpu.core_type = #tpu.core_type<tc>, window_params = [{pipeline_mode = #tpu.pipeline_mode<synchronous>, transform_indices = @transform_0, window_bounds = array<i64: 8, 2, 32>}, {pipeline_mode = #tpu.pipeline_mode<synchronous>, transform_indices = @transform_1, window_bounds = array<i64: 1, 8, 2, 32>}, {pipeline_mode = #tpu.pipeline_mode<synchronous>, transform_indices = @transform_2, window_bounds = array<i64: 1, 8, 2, 32>}, {pipeline_mode = #tpu.pipeline_mode<synchronous>, transform_indices = @transform_3, window_bounds = array<i64: 1, 1, 32>}, {pipeline_mode = #tpu.pipeline_mode<synchronous>, transform_indices = @transform_4, window_bounds = array<i64: 1, 1, 32>}, {pipeline_mode = #tpu.pipeline_mode<synchronous>, transform_indices = @transform_5, window_bounds = array<i64: 1, 1, 32>}, {pipeline_mode = #tpu.pipeline_mode<synchronous>, transform_indices = @transform_6, window_bounds = array<i64: 1, 1, 32>}, {pipeline_mode = #tpu.pipeline_mode<synchronous>, transform_indices = @transform_7, window_bounds = array<i64: 1, 1, 32>}, {pipeline_mode = #tpu.pipeline_mode<synchronous>, transform_indices = @transform_8, window_bounds = array<i64: 1, 1, 32>}, {pipeline_mode = #tpu.pipeline_mode<synchronous>, transform_indices = @transform_9, window_bounds = array<i64: 1, 1, 32>}, {pipeline_mode = #tpu.pipeline_mode<synchronous>, transform_indices = @transform_10, window_bounds = array<i64: 1, 1, 32>}, {pipeline_mode = #tpu.pipeline_mode<synchronous>, transform_indices = @transform_11, window_bounds = array<i64: 1, 1, 32>}, {pipeline_mode = #tpu.pipeline_mode<synchronous>, transform_indices = @transform_12, window_bounds = array<i64: 32, 2>}, {pipeline_mode = #tpu.pipeline_mode<synchronous>, transform_indices = @transform_13, window_bounds = array<i64: 1, 2>}, {pipeline_mode = #tpu.pipeline_mode<synchronous>, transform_indices = @transform_14, window_bounds = array<i64: 8, 2, 32>}, {pipeline_mode = #tpu.pipeline_mode<synchronous>, transform_indices = @transform_15, window_bounds = array<i64: 2, 2>}]} {
    %c0 = arith.constant 0 : index
    %c0_0 = arith.constant 0 : index
    %c0_1 = arith.constant 0 : index
    %0 = vector.load %arg4[%c0, %c0_0, %c0_1] : memref<1x1x32xf32, #tpu.memory_space<vmem>>, vector<1x1x32xf32>
    %1 = vector.shape_cast %0 : vector<1x1x32xf32> to vector<1x32xf32>
    %2 = vector.shape_cast %1 : vector<1x32xf32> to vector<1x32xf32>
    %3 = vector.broadcast %2 : vector<1x32xf32> to vector<2x32xf32>
    %c0_2 = arith.constant 0 : index
    %c0_3 = arith.constant 0 : index
    %c0_4 = arith.constant 0 : index
    %4 = vector.load %arg5[%c0_2, %c0_3, %c0_4] : memref<1x1x32xf32, #tpu.memory_space<vmem>>, vector<1x1x32xf32>
    %5 = vector.shape_cast %4 : vector<1x1x32xf32> to vector<1x32xf32>
    %6 = vector.shape_cast %5 : vector<1x32xf32> to vector<1x32xf32>
    %7 = vector.broadcast %6 : vector<1x32xf32> to vector<2x32xf32>
    %c0_5 = arith.constant 0 : index
    %c0_6 = arith.constant 0 : index
    %c0_7 = arith.constant 0 : index
    %8 = vector.load %arg6[%c0_5, %c0_6, %c0_7] : memref<1x1x32xf32, #tpu.memory_space<vmem>>, vector<1x1x32xf32>
    %9 = vector.shape_cast %8 : vector<1x1x32xf32> to vector<1x32xf32>
    %10 = vector.shape_cast %9 : vector<1x32xf32> to vector<1x32xf32>
    %11 = vector.broadcast %10 : vector<1x32xf32> to vector<2x32xf32>
    %c0_8 = arith.constant 0 : index
    %c0_9 = arith.constant 0 : index
    %c0_10 = arith.constant 0 : index
    %12 = vector.load %arg7[%c0_8, %c0_9, %c0_10] : memref<1x1x32xf32, #tpu.memory_space<vmem>>, vector<1x1x32xf32>
    %13 = vector.shape_cast %12 : vector<1x1x32xf32> to vector<1x32xf32>
    %14 = vector.shape_cast %13 : vector<1x32xf32> to vector<1x32xf32>
    %15 = vector.broadcast %14 : vector<1x32xf32> to vector<2x32xf32>
    %c0_11 = arith.constant 0 : index
    %c0_12 = arith.constant 0 : index
    %c0_13 = arith.constant 0 : index
    %16 = vector.load %arg8[%c0_11, %c0_12, %c0_13] : memref<1x1x32xf32, #tpu.memory_space<vmem>>, vector<1x1x32xf32>
    %17 = vector.shape_cast %16 : vector<1x1x32xf32> to vector<1x32xf32>
    %18 = vector.shape_cast %17 : vector<1x32xf32> to vector<1x32xf32>
    %19 = vector.broadcast %18 : vector<1x32xf32> to vector<2x32xf32>
    %c0_14 = arith.constant 0 : index
    %c0_15 = arith.constant 0 : index
    %c0_16 = arith.constant 0 : index
    %20 = vector.load %arg9[%c0_14, %c0_15, %c0_16] : memref<1x1x32xf32, #tpu.memory_space<vmem>>, vector<1x1x32xf32>
    %21 = vector.shape_cast %20 : vector<1x1x32xf32> to vector<1x32xf32>
    %22 = vector.shape_cast %21 : vector<1x32xf32> to vector<1x32xf32>
    %23 = vector.broadcast %22 : vector<1x32xf32> to vector<2x32xf32>
    %c0_17 = arith.constant 0 : index
    %c0_18 = arith.constant 0 : index
    %c0_19 = arith.constant 0 : index
    %24 = vector.load %arg10[%c0_17, %c0_18, %c0_19] : memref<1x1x32xf32, #tpu.memory_space<vmem>>, vector<1x1x32xf32>
    %25 = vector.shape_cast %24 : vector<1x1x32xf32> to vector<1x32xf32>
    %26 = vector.shape_cast %25 : vector<1x32xf32> to vector<1x32xf32>
    %27 = vector.broadcast %26 : vector<1x32xf32> to vector<2x32xf32>
    %c0_20 = arith.constant 0 : index
    %c0_21 = arith.constant 0 : index
    %c0_22 = arith.constant 0 : index
    %28 = vector.load %arg11[%c0_20, %c0_21, %c0_22] : memref<1x1x32xf32, #tpu.memory_space<vmem>>, vector<1x1x32xf32>
    %29 = vector.shape_cast %28 : vector<1x1x32xf32> to vector<1x32xf32>
    %30 = vector.shape_cast %29 : vector<1x32xf32> to vector<1x32xf32>
    %31 = vector.broadcast %30 : vector<1x32xf32> to vector<2x32xf32>
    %c0_23 = arith.constant 0 : index
    %c0_24 = arith.constant 0 : index
    %c0_25 = arith.constant 0 : index
    %32 = vector.load %arg12[%c0_23, %c0_24, %c0_25] : memref<1x1x32xf32, #tpu.memory_space<vmem>>, vector<1x1x32xf32>
    %33 = vector.shape_cast %32 : vector<1x1x32xf32> to vector<1x32xf32>
    %34 = vector.shape_cast %33 : vector<1x32xf32> to vector<1x32xf32>
    %35 = vector.broadcast %34 : vector<1x32xf32> to vector<2x32xf32>
    %cst = arith.constant 0.000000e+00 : f32
    %36 = vector.broadcast %cst : f32 to vector<2x32xf32>
    %c0_i32 = arith.constant 0 : i32
    %c0_i32_26 = arith.constant 0 : i32
    %c0_i32_27 = arith.constant 0 : i32
    %37 = arith.index_cast %c0_i32_27 : i32 to index
    %c0_28 = arith.constant 0 : index
    %c0_29 = arith.constant 0 : index
    %38 = vector.load %arg1[%37, %c0_28, %c0_29] : memref<8x2x32xf32, #tpu.memory_space<vmem>>, vector<1x2x32xf32>
    %39 = vector.shape_cast %38 : vector<1x2x32xf32> to vector<2x32xf32>
    %40 = arith.mulf %39, %3 : vector<2x32xf32>
    %41 = arith.addf %40, %27 : vector<2x32xf32>
    %42 = arith.mulf %36, %15 : vector<2x32xf32>
    %43 = arith.addf %41, %42 : vector<2x32xf32>
    %44 = arith.negf %43 : vector<2x32xf32>
    %45 = math.exp %44 : vector<2x32xf32>
    %cst_30 = arith.constant 1.000000e+00 : f32
    %46 = vector.broadcast %cst_30 : f32 to vector<2x32xf32>
    %47 = arith.addf %46, %45 : vector<2x32xf32>
    %48 = arith.divf %46, %47 : vector<2x32xf32>
    %49 = arith.mulf %39, %7 : vector<2x32xf32>
    %50 = arith.addf %49, %31 : vector<2x32xf32>
    %51 = arith.mulf %36, %19 : vector<2x32xf32>
    %52 = arith.addf %50, %51 : vector<2x32xf32>
    %53 = arith.negf %52 : vector<2x32xf32>
    %54 = math.exp %53 : vector<2x32xf32>
    %cst_31 = arith.constant 1.000000e+00 : f32
    %55 = vector.broadcast %cst_31 : f32 to vector<2x32xf32>
    %56 = arith.addf %55, %54 : vector<2x32xf32>
    %57 = arith.divf %55, %56 : vector<2x32xf32>
    %58 = arith.mulf %39, %11 : vector<2x32xf32>
    %59 = arith.addf %58, %35 : vector<2x32xf32>
    %60 = arith.mulf %36, %48 : vector<2x32xf32>
    %61 = arith.mulf %60, %23 : vector<2x32xf32>
    %62 = arith.addf %59, %61 : vector<2x32xf32>
    %63 = math.tanh %62 : vector<2x32xf32>
    %cst_32 = arith.constant 1.000000e+00 : f32
    %64 = vector.broadcast %cst_32 : f32 to vector<2x32xf32>
    %65 = arith.subf %64, %57 : vector<2x32xf32>
    %66 = arith.mulf %65, %36 : vector<2x32xf32>
    %67 = arith.mulf %57, %63 : vector<2x32xf32>
    %68 = arith.addf %66, %67 : vector<2x32xf32>
    %c0_i32_33 = arith.constant 0 : i32
    %c0_i32_34 = arith.constant 0 : i32
    %c0_i32_35 = arith.constant 0 : i32
    %69 = tpu.memref_slice %arg2[%c0_i32, %c0_i32_33, %c0_i32_34, %c0_i32_35] : memref<1x8x2x32xf32, #tpu.memory_space<vmem>> -> memref<1x8x2x32xf32, #tpu.memory_space<vmem>>
    %70 = tpu.memref_squeeze %69 : memref<1x8x2x32xf32, #tpu.memory_space<vmem>> -> memref<8x2x32xf32, #tpu.memory_space<vmem>>
    %71 = arith.index_cast %c0_i32_27 : i32 to index
    %c0_36 = arith.constant 0 : index
    %c0_37 = arith.constant 0 : index
    %72 = vector.load %70[%71, %c0_36, %c0_37] : memref<8x2x32xf32, #tpu.memory_space<vmem>>, vector<1x2x32xf32>
    %73 = vector.shape_cast %72 : vector<1x2x32xf32> to vector<2x32xf32>
    %74 = arith.subf %68, %73 : vector<2x32xf32>
    %c0_i32_38 = arith.constant 0 : i32
    %c0_i32_39 = arith.constant 0 : i32
    %c0_i32_40 = arith.constant 0 : i32
    %75 = tpu.memref_slice %arg3[%c0_i32_26, %c0_i32_38, %c0_i32_39, %c0_i32_40] : memref<1x8x2x32xf32, #tpu.memory_space<vmem>> -> memref<1x8x2x32xf32, #tpu.memory_space<vmem>>
    %76 = tpu.memref_squeeze %75 : memref<1x8x2x32xf32, #tpu.memory_space<vmem>> -> memref<8x2x32xf32, #tpu.memory_space<vmem>>
    %77 = arith.index_cast %c0_i32_27 : i32 to index
    %c0_41 = arith.constant 0 : index
    %c0_42 = arith.constant 0 : index
    %78 = vector.load %76[%77, %c0_41, %c0_42] : memref<8x2x32xf32, #tpu.memory_space<vmem>>, vector<1x2x32xf32>
    %79 = vector.shape_cast %78 : vector<1x2x32xf32> to vector<2x32xf32>
    %80 = arith.mulf %74, %79 : vector<2x32xf32>
    %81 = arith.addf %73, %80 : vector<2x32xf32>
    %82 = arith.index_cast %c0_i32_27 : i32 to index
    %c0_43 = arith.constant 0 : index
    %c0_44 = arith.constant 0 : index
    %83 = vector.load %arg15[%82, %c0_43, %c0_44] : memref<8x2x32xf32, #tpu.memory_space<vmem>>, vector<1x2x32xf32>
    %84 = vector.shape_cast %83 : vector<1x2x32xf32> to vector<2x32xf32>
    %85 = vector.shape_cast %81 : vector<2x32xf32> to vector<1x2x32xf32>
    tpu.vector_store %arg15[%82, %c0_43, %c0_44], %85 {strides = array<i32>} : memref<8x2x32xf32, #tpu.memory_space<vmem>>, vector<1x2x32xf32>,
    %c1_i32 = arith.constant 1 : i32
    %86 = arith.index_cast %c1_i32 : i32 to index
    %c0_45 = arith.constant 0 : index
    %c0_46 = arith.constant 0 : index
    %87 = vector.load %arg1[%86, %c0_45, %c0_46] : memref<8x2x32xf32, #tpu.memory_space<vmem>>, vector<1x2x32xf32>
    %88 = vector.shape_cast %87 : vector<1x2x32xf32> to vector<2x32xf32>
    %89 = arith.mulf %88, %3 : vector<2x32xf32>
    %90 = arith.addf %89, %27 : vector<2x32xf32>
    %91 = arith.mulf %81, %15 : vector<2x32xf32>
    %92 = arith.addf %90, %91 : vector<2x32xf32>
    %93 = arith.negf %92 : vector<2x32xf32>
    %94 = math.exp %93 : vector<2x32xf32>
    %cst_47 = arith.constant 1.000000e+00 : f32
    %95 = vector.broadcast %cst_47 : f32 to vector<2x32xf32>
    %96 = arith.addf %95, %94 : vector<2x32xf32>
    %97 = arith.divf %95, %96 : vector<2x32xf32>
    %98 = arith.mulf %88, %7 : vector<2x32xf32>
    %99 = arith.addf %98, %31 : vector<2x32xf32>
    %100 = arith.mulf %81, %19 : vector<2x32xf32>
    %101 = arith.addf %99, %100 : vector<2x32xf32>
    %102 = arith.negf %101 : vector<2x32xf32>
    %103 = math.exp %102 : vector<2x32xf32>
    %cst_48 = arith.constant 1.000000e+00 : f32
    %104 = vector.broadcast %cst_48 : f32 to vector<2x32xf32>
    %105 = arith.addf %104, %103 : vector<2x32xf32>
    %106 = arith.divf %104, %105 : vector<2x32xf32>
    %107 = arith.mulf %88, %11 : vector<2x32xf32>
    %108 = arith.addf %107, %35 : vector<2x32xf32>
    %109 = arith.mulf %81, %97 : vector<2x32xf32>
    %110 = arith.mulf %109, %23 : vector<2x32xf32>
    %111 = arith.addf %108, %110 : vector<2x32xf32>
    %112 = math.tanh %111 : vector<2x32xf32>
    %cst_49 = arith.constant 1.000000e+00 : f32
    %113 = vector.broadcast %cst_49 : f32 to vector<2x32xf32>
    %114 = arith.subf %113, %106 : vector<2x32xf32>
    %115 = arith.mulf %114, %81 : vector<2x32xf32>
    %116 = arith.mulf %106, %112 : vector<2x32xf32>
    %117 = arith.addf %115, %116 : vector<2x32xf32>
    %c0_i32_50 = arith.constant 0 : i32
    %c0_i32_51 = arith.constant 0 : i32
    %c0_i32_52 = arith.constant 0 : i32
    %118 = tpu.memref_slice %arg2[%c0_i32, %c0_i32_50, %c0_i32_51, %c0_i32_52] : memref<1x8x2x32xf32, #tpu.memory_space<vmem>> -> memref<1x8x2x32xf32, #tpu.memory_space<vmem>>
    %119 = tpu.memref_squeeze %118 : memref<1x8x2x32xf32, #tpu.memory_space<vmem>> -> memref<8x2x32xf32, #tpu.memory_space<vmem>>
    %120 = arith.index_cast %c1_i32 : i32 to index
    %c0_53 = arith.constant 0 : index
    %c0_54 = arith.constant 0 : index
    %121 = vector.load %119[%120, %c0_53, %c0_54] : memref<8x2x32xf32, #tpu.memory_space<vmem>>, vector<1x2x32xf32>
    %122 = vector.shape_cast %121 : vector<1x2x32xf32> to vector<2x32xf32>
    %123 = arith.subf %117, %122 : vector<2x32xf32>
    %c0_i32_55 = arith.constant 0 : i32
    %c0_i32_56 = arith.constant 0 : i32
    %c0_i32_57 = arith.constant 0 : i32
    %124 = tpu.memref_slice %arg3[%c0_i32_26, %c0_i32_55, %c0_i32_56, %c0_i32_57] : memref<1x8x2x32xf32, #tpu.memory_space<vmem>> -> memref<1x8x2x32xf32, #tpu.memory_space<vmem>>
    %125 = tpu.memref_squeeze %124 : memref<1x8x2x32xf32, #tpu.memory_space<vmem>> -> memref<8x2x32xf32, #tpu.memory_space<vmem>>
    %126 = arith.index_cast %c1_i32 : i32 to index
    %c0_58 = arith.constant 0 : index
    %c0_59 = arith.constant 0 : index
    %127 = vector.load %125[%126, %c0_58, %c0_59] : memref<8x2x32xf32, #tpu.memory_space<vmem>>, vector<1x2x32xf32>
    %128 = vector.shape_cast %127 : vector<1x2x32xf32> to vector<2x32xf32>
    %129 = arith.mulf %123, %128 : vector<2x32xf32>
    %130 = arith.addf %122, %129 : vector<2x32xf32>
    %131 = arith.index_cast %c1_i32 : i32 to index
    %c0_60 = arith.constant 0 : index
    %c0_61 = arith.constant 0 : index
    %132 = vector.load %arg15[%131, %c0_60, %c0_61] : memref<8x2x32xf32, #tpu.memory_space<vmem>>, vector<1x2x32xf32>
    %133 = vector.shape_cast %132 : vector<1x2x32xf32> to vector<2x32xf32>
    %134 = vector.shape_cast %130 : vector<2x32xf32> to vector<1x2x32xf32>
    tpu.vector_store %arg15[%131, %c0_60, %c0_61], %134 {strides = array<i32>} : memref<8x2x32xf32, #tpu.memory_space<vmem>>, vector<1x2x32xf32>,
    %c2_i32 = arith.constant 2 : i32
    %135 = arith.index_cast %c2_i32 : i32 to index
    %c0_62 = arith.constant 0 : index
    %c0_63 = arith.constant 0 : index
    %136 = vector.load %arg1[%135, %c0_62, %c0_63] : memref<8x2x32xf32, #tpu.memory_space<vmem>>, vector<1x2x32xf32>
    %137 = vector.shape_cast %136 : vector<1x2x32xf32> to vector<2x32xf32>
    %138 = arith.mulf %137, %3 : vector<2x32xf32>
    %139 = arith.addf %138, %27 : vector<2x32xf32>
    %140 = arith.mulf %130, %15 : vector<2x32xf32>
    %141 = arith.addf %139, %140 : vector<2x32xf32>
    %142 = arith.negf %141 : vector<2x32xf32>
    %143 = math.exp %142 : vector<2x32xf32>
    %cst_64 = arith.constant 1.000000e+00 : f32
    %144 = vector.broadcast %cst_64 : f32 to vector<2x32xf32>
    %145 = arith.addf %144, %143 : vector<2x32xf32>
    %146 = arith.divf %144, %145 : vector<2x32xf32>
    %147 = arith.mulf %137, %7 : vector<2x32xf32>
    %148 = arith.addf %147, %31 : vector<2x32xf32>
    %149 = arith.mulf %130, %19 : vector<2x32xf32>
    %150 = arith.addf %148, %149 : vector<2x32xf32>
    %151 = arith.negf %150 : vector<2x32xf32>
    %152 = math.exp %151 : vector<2x32xf32>
    %cst_65 = arith.constant 1.000000e+00 : f32
    %153 = vector.broadcast %cst_65 : f32 to vector<2x32xf32>
    %154 = arith.addf %153, %152 : vector<2x32xf32>
    %155 = arith.divf %153, %154 : vector<2x32xf32>
    %156 = arith.mulf %137, %11 : vector<2x32xf32>
    %157 = arith.addf %156, %35 : vector<2x32xf32>
    %158 = arith.mulf %130, %146 : vector<2x32xf32>
    %159 = arith.mulf %158, %23 : vector<2x32xf32>
    %160 = arith.addf %157, %159 : vector<2x32xf32>
    %161 = math.tanh %160 : vector<2x32xf32>
    %cst_66 = arith.constant 1.000000e+00 : f32
    %162 = vector.broadcast %cst_66 : f32 to vector<2x32xf32>
    %163 = arith.subf %162, %155 : vector<2x32xf32>
    %164 = arith.mulf %163, %130 : vector<2x32xf32>
    %165 = arith.mulf %155, %161 : vector<2x32xf32>
    %166 = arith.addf %164, %165 : vector<2x32xf32>
    %c0_i32_67 = arith.constant 0 : i32
    %c0_i32_68 = arith.constant 0 : i32
    %c0_i32_69 = arith.constant 0 : i32
    %167 = tpu.memref_slice %arg2[%c0_i32, %c0_i32_67, %c0_i32_68, %c0_i32_69] : memref<1x8x2x32xf32, #tpu.memory_space<vmem>> -> memref<1x8x2x32xf32, #tpu.memory_space<vmem>>
    %168 = tpu.memref_squeeze %167 : memref<1x8x2x32xf32, #tpu.memory_space<vmem>> -> memref<8x2x32xf32, #tpu.memory_space<vmem>>
    %169 = arith.index_cast %c2_i32 : i32 to index
    %c0_70 = arith.constant 0 : index
    %c0_71 = arith.constant 0 : index
    %170 = vector.load %168[%169, %c0_70, %c0_71] : memref<8x2x32xf32, #tpu.memory_space<vmem>>, vector<1x2x32xf32>
    %171 = vector.shape_cast %170 : vector<1x2x32xf32> to vector<2x32xf32>
    %172 = arith.subf %166, %171 : vector<2x32xf32>
    %c0_i32_72 = arith.constant 0 : i32
    %c0_i32_73 = arith.constant 0 : i32
    %c0_i32_74 = arith.constant 0 : i32
    %173 = tpu.memref_slice %arg3[%c0_i32_26, %c0_i32_72, %c0_i32_73, %c0_i32_74] : memref<1x8x2x32xf32, #tpu.memory_space<vmem>> -> memref<1x8x2x32xf32, #tpu.memory_space<vmem>>
    %174 = tpu.memref_squeeze %173 : memref<1x8x2x32xf32, #tpu.memory_space<vmem>> -> memref<8x2x32xf32, #tpu.memory_space<vmem>>
    %175 = arith.index_cast %c2_i32 : i32 to index
    %c0_75 = arith.constant 0 : index
    %c0_76 = arith.constant 0 : index
    %176 = vector.load %174[%175, %c0_75, %c0_76] : memref<8x2x32xf32, #tpu.memory_space<vmem>>, vector<1x2x32xf32>
    %177 = vector.shape_cast %176 : vector<1x2x32xf32> to vector<2x32xf32>
    %178 = arith.mulf %172, %177 : vector<2x32xf32>
    %179 = arith.addf %171, %178 : vector<2x32xf32>
    %180 = arith.index_cast %c2_i32 : i32 to index
    %c0_77 = arith.constant 0 : index
    %c0_78 = arith.constant 0 : index
    %181 = vector.load %arg15[%180, %c0_77, %c0_78] : memref<8x2x32xf32, #tpu.memory_space<vmem>>, vector<1x2x32xf32>
    %182 = vector.shape_cast %181 : vector<1x2x32xf32> to vector<2x32xf32>
    %183 = vector.shape_cast %179 : vector<2x32xf32> to vector<1x2x32xf32>
    tpu.vector_store %arg15[%180, %c0_77, %c0_78], %183 {strides = array<i32>} : memref<8x2x32xf32, #tpu.memory_space<vmem>>, vector<1x2x32xf32>,
    %c3_i32 = arith.constant 3 : i32
    %184 = arith.index_cast %c3_i32 : i32 to index
    %c0_79 = arith.constant 0 : index
    %c0_80 = arith.constant 0 : index
    %185 = vector.load %arg1[%184, %c0_79, %c0_80] : memref<8x2x32xf32, #tpu.memory_space<vmem>>, vector<1x2x32xf32>
    %186 = vector.shape_cast %185 : vector<1x2x32xf32> to vector<2x32xf32>
    %187 = arith.mulf %186, %3 : vector<2x32xf32>
    %188 = arith.addf %187, %27 : vector<2x32xf32>
    %189 = arith.mulf %179, %15 : vector<2x32xf32>
    %190 = arith.addf %188, %189 : vector<2x32xf32>
    %191 = arith.negf %190 : vector<2x32xf32>
    %192 = math.exp %191 : vector<2x32xf32>
    %cst_81 = arith.constant 1.000000e+00 : f32
    %193 = vector.broadcast %cst_81 : f32 to vector<2x32xf32>
    %194 = arith.addf %193, %192 : vector<2x32xf32>
    %195 = arith.divf %193, %194 : vector<2x32xf32>
    %196 = arith.mulf %186, %7 : vector<2x32xf32>
    %197 = arith.addf %196, %31 : vector<2x32xf32>
    %198 = arith.mulf %179, %19 : vector<2x32xf32>
    %199 = arith.addf %197, %198 : vector<2x32xf32>
    %200 = arith.negf %199 : vector<2x32xf32>
    %201 = math.exp %200 : vector<2x32xf32>
    %cst_82 = arith.constant 1.000000e+00 : f32
    %202 = vector.broadcast %cst_82 : f32 to vector<2x32xf32>
    %203 = arith.addf %202, %201 : vector<2x32xf32>
    %204 = arith.divf %202, %203 : vector<2x32xf32>
    %205 = arith.mulf %186, %11 : vector<2x32xf32>
    %206 = arith.addf %205, %35 : vector<2x32xf32>
    %207 = arith.mulf %179, %195 : vector<2x32xf32>
    %208 = arith.mulf %207, %23 : vector<2x32xf32>
    %209 = arith.addf %206, %208 : vector<2x32xf32>
    %210 = math.tanh %209 : vector<2x32xf32>
    %cst_83 = arith.constant 1.000000e+00 : f32
    %211 = vector.broadcast %cst_83 : f32 to vector<2x32xf32>
    %212 = arith.subf %211, %204 : vector<2x32xf32>
    %213 = arith.mulf %212, %179 : vector<2x32xf32>
    %214 = arith.mulf %204, %210 : vector<2x32xf32>
    %215 = arith.addf %213, %214 : vector<2x32xf32>
    %c0_i32_84 = arith.constant 0 : i32
    %c0_i32_85 = arith.constant 0 : i32
    %c0_i32_86 = arith.constant 0 : i32
    %216 = tpu.memref_slice %arg2[%c0_i32, %c0_i32_84, %c0_i32_85, %c0_i32_86] : memref<1x8x2x32xf32, #tpu.memory_space<vmem>> -> memref<1x8x2x32xf32, #tpu.memory_space<vmem>>
    %217 = tpu.memref_squeeze %216 : memref<1x8x2x32xf32, #tpu.memory_space<vmem>> -> memref<8x2x32xf32, #tpu.memory_space<vmem>>
    %218 = arith.index_cast %c3_i32 : i32 to index
    %c0_87 = arith.constant 0 : index
    %c0_88 = arith.constant 0 : index
    %219 = vector.load %217[%218, %c0_87, %c0_88] : memref<8x2x32xf32, #tpu.memory_space<vmem>>, vector<1x2x32xf32>
    %220 = vector.shape_cast %219 : vector<1x2x32xf32> to vector<2x32xf32>
    %221 = arith.subf %215, %220 : vector<2x32xf32>
    %c0_i32_89 = arith.constant 0 : i32
    %c0_i32_90 = arith.constant 0 : i32
    %c0_i32_91 = arith.constant 0 : i32
    %222 = tpu.memref_slice %arg3[%c0_i32_26, %c0_i32_89, %c0_i32_90, %c0_i32_91] : memref<1x8x2x32xf32, #tpu.memory_space<vmem>> -> memref<1x8x2x32xf32, #tpu.memory_space<vmem>>
    %223 = tpu.memref_squeeze %222 : memref<1x8x2x32xf32, #tpu.memory_space<vmem>> -> memref<8x2x32xf32, #tpu.memory_space<vmem>>
    %224 = arith.index_cast %c3_i32 : i32 to index
    %c0_92 = arith.constant 0 : index
    %c0_93 = arith.constant 0 : index
    %225 = vector.load %223[%224, %c0_92, %c0_93] : memref<8x2x32xf32, #tpu.memory_space<vmem>>, vector<1x2x32xf32>
    %226 = vector.shape_cast %225 : vector<1x2x32xf32> to vector<2x32xf32>
    %227 = arith.mulf %221, %226 : vector<2x32xf32>
    %228 = arith.addf %220, %227 : vector<2x32xf32>
    %229 = arith.index_cast %c3_i32 : i32 to index
    %c0_94 = arith.constant 0 : index
    %c0_95 = arith.constant 0 : index
    %230 = vector.load %arg15[%229, %c0_94, %c0_95] : memref<8x2x32xf32, #tpu.memory_space<vmem>>, vector<1x2x32xf32>
    %231 = vector.shape_cast %230 : vector<1x2x32xf32> to vector<2x32xf32>
    %232 = vector.shape_cast %228 : vector<2x32xf32> to vector<1x2x32xf32>
    tpu.vector_store %arg15[%229, %c0_94, %c0_95], %232 {strides = array<i32>} : memref<8x2x32xf32, #tpu.memory_space<vmem>>, vector<1x2x32xf32>,
    %c4_i32 = arith.constant 4 : i32
    %233 = arith.index_cast %c4_i32 : i32 to index
    %c0_96 = arith.constant 0 : index
    %c0_97 = arith.constant 0 : index
    %234 = vector.load %arg1[%233, %c0_96, %c0_97] : memref<8x2x32xf32, #tpu.memory_space<vmem>>, vector<1x2x32xf32>
    %235 = vector.shape_cast %234 : vector<1x2x32xf32> to vector<2x32xf32>
    %236 = arith.mulf %235, %3 : vector<2x32xf32>
    %237 = arith.addf %236, %27 : vector<2x32xf32>
    %238 = arith.mulf %228, %15 : vector<2x32xf32>
    %239 = arith.addf %237, %238 : vector<2x32xf32>
    %240 = arith.negf %239 : vector<2x32xf32>
    %241 = math.exp %240 : vector<2x32xf32>
    %cst_98 = arith.constant 1.000000e+00 : f32
    %242 = vector.broadcast %cst_98 : f32 to vector<2x32xf32>
    %243 = arith.addf %242, %241 : vector<2x32xf32>
    %244 = arith.divf %242, %243 : vector<2x32xf32>
    %245 = arith.mulf %235, %7 : vector<2x32xf32>
    %246 = arith.addf %245, %31 : vector<2x32xf32>
    %247 = arith.mulf %228, %19 : vector<2x32xf32>
    %248 = arith.addf %246, %247 : vector<2x32xf32>
    %249 = arith.negf %248 : vector<2x32xf32>
    %250 = math.exp %249 : vector<2x32xf32>
    %cst_99 = arith.constant 1.000000e+00 : f32
    %251 = vector.broadcast %cst_99 : f32 to vector<2x32xf32>
    %252 = arith.addf %251, %250 : vector<2x32xf32>
    %253 = arith.divf %251, %252 : vector<2x32xf32>
    %254 = arith.mulf %235, %11 : vector<2x32xf32>
    %255 = arith.addf %254, %35 : vector<2x32xf32>
    %256 = arith.mulf %228, %244 : vector<2x32xf32>
    %257 = arith.mulf %256, %23 : vector<2x32xf32>
    %258 = arith.addf %255, %257 : vector<2x32xf32>
    %259 = math.tanh %258 : vector<2x32xf32>
    %cst_100 = arith.constant 1.000000e+00 : f32
    %260 = vector.broadcast %cst_100 : f32 to vector<2x32xf32>
    %261 = arith.subf %260, %253 : vector<2x32xf32>
    %262 = arith.mulf %261, %228 : vector<2x32xf32>
    %263 = arith.mulf %253, %259 : vector<2x32xf32>
    %264 = arith.addf %262, %263 : vector<2x32xf32>
    %c0_i32_101 = arith.constant 0 : i32
    %c0_i32_102 = arith.constant 0 : i32
    %c0_i32_103 = arith.constant 0 : i32
    %265 = tpu.memref_slice %arg2[%c0_i32, %c0_i32_101, %c0_i32_102, %c0_i32_103] : memref<1x8x2x32xf32, #tpu.memory_space<vmem>> -> memref<1x8x2x32xf32, #tpu.memory_space<vmem>>
    %266 = tpu.memref_squeeze %265 : memref<1x8x2x32xf32, #tpu.memory_space<vmem>> -> memref<8x2x32xf32, #tpu.memory_space<vmem>>
    %267 = arith.index_cast %c4_i32 : i32 to index
    %c0_104 = arith.constant 0 : index
    %c0_105 = arith.constant 0 : index
    %268 = vector.load %266[%267, %c0_104, %c0_105] : memref<8x2x32xf32, #tpu.memory_space<vmem>>, vector<1x2x32xf32>
    %269 = vector.shape_cast %268 : vector<1x2x32xf32> to vector<2x32xf32>
    %270 = arith.subf %264, %269 : vector<2x32xf32>
    %c0_i32_106 = arith.constant 0 : i32
    %c0_i32_107 = arith.constant 0 : i32
    %c0_i32_108 = arith.constant 0 : i32
    %271 = tpu.memref_slice %arg3[%c0_i32_26, %c0_i32_106, %c0_i32_107, %c0_i32_108] : memref<1x8x2x32xf32, #tpu.memory_space<vmem>> -> memref<1x8x2x32xf32, #tpu.memory_space<vmem>>
    %272 = tpu.memref_squeeze %271 : memref<1x8x2x32xf32, #tpu.memory_space<vmem>> -> memref<8x2x32xf32, #tpu.memory_space<vmem>>
    %273 = arith.index_cast %c4_i32 : i32 to index
    %c0_109 = arith.constant 0 : index
    %c0_110 = arith.constant 0 : index
    %274 = vector.load %272[%273, %c0_109, %c0_110] : memref<8x2x32xf32, #tpu.memory_space<vmem>>, vector<1x2x32xf32>
    %275 = vector.shape_cast %274 : vector<1x2x32xf32> to vector<2x32xf32>
    %276 = arith.mulf %270, %275 : vector<2x32xf32>
    %277 = arith.addf %269, %276 : vector<2x32xf32>
    %278 = arith.index_cast %c4_i32 : i32 to index
    %c0_111 = arith.constant 0 : index
    %c0_112 = arith.constant 0 : index
    %279 = vector.load %arg15[%278, %c0_111, %c0_112] : memref<8x2x32xf32, #tpu.memory_space<vmem>>, vector<1x2x32xf32>
    %280 = vector.shape_cast %279 : vector<1x2x32xf32> to vector<2x32xf32>
    %281 = vector.shape_cast %277 : vector<2x32xf32> to vector<1x2x32xf32>
    tpu.vector_store %arg15[%278, %c0_111, %c0_112], %281 {strides = array<i32>} : memref<8x2x32xf32, #tpu.memory_space<vmem>>, vector<1x2x32xf32>,
    %c5_i32 = arith.constant 5 : i32
    %282 = arith.index_cast %c5_i32 : i32 to index
    %c0_113 = arith.constant 0 : index
    %c0_114 = arith.constant 0 : index
    %283 = vector.load %arg1[%282, %c0_113, %c0_114] : memref<8x2x32xf32, #tpu.memory_space<vmem>>, vector<1x2x32xf32>
    %284 = vector.shape_cast %283 : vector<1x2x32xf32> to vector<2x32xf32>
    %285 = arith.mulf %284, %3 : vector<2x32xf32>
    %286 = arith.addf %285, %27 : vector<2x32xf32>
    %287 = arith.mulf %277, %15 : vector<2x32xf32>
    %288 = arith.addf %286, %287 : vector<2x32xf32>
    %289 = arith.negf %288 : vector<2x32xf32>
    %290 = math.exp %289 : vector<2x32xf32>
    %cst_115 = arith.constant 1.000000e+00 : f32
    %291 = vector.broadcast %cst_115 : f32 to vector<2x32xf32>
    %292 = arith.addf %291, %290 : vector<2x32xf32>
    %293 = arith.divf %291, %292 : vector<2x32xf32>
    %294 = arith.mulf %284, %7 : vector<2x32xf32>
    %295 = arith.addf %294, %31 : vector<2x32xf32>
    %296 = arith.mulf %277, %19 : vector<2x32xf32>
    %297 = arith.addf %295, %296 : vector<2x32xf32>
    %298 = arith.negf %297 : vector<2x32xf32>
    %299 = math.exp %298 : vector<2x32xf32>
    %cst_116 = arith.constant 1.000000e+00 : f32
    %300 = vector.broadcast %cst_116 : f32 to vector<2x32xf32>
    %301 = arith.addf %300, %299 : vector<2x32xf32>
    %302 = arith.divf %300, %301 : vector<2x32xf32>
    %303 = arith.mulf %284, %11 : vector<2x32xf32>
    %304 = arith.addf %303, %35 : vector<2x32xf32>
    %305 = arith.mulf %277, %293 : vector<2x32xf32>
    %306 = arith.mulf %305, %23 : vector<2x32xf32>
    %307 = arith.addf %304, %306 : vector<2x32xf32>
    %308 = math.tanh %307 : vector<2x32xf32>
    %cst_117 = arith.constant 1.000000e+00 : f32
    %309 = vector.broadcast %cst_117 : f32 to vector<2x32xf32>
    %310 = arith.subf %309, %302 : vector<2x32xf32>
    %311 = arith.mulf %310, %277 : vector<2x32xf32>
    %312 = arith.mulf %302, %308 : vector<2x32xf32>
    %313 = arith.addf %311, %312 : vector<2x32xf32>
    %c0_i32_118 = arith.constant 0 : i32
    %c0_i32_119 = arith.constant 0 : i32
    %c0_i32_120 = arith.constant 0 : i32
    %314 = tpu.memref_slice %arg2[%c0_i32, %c0_i32_118, %c0_i32_119, %c0_i32_120] : memref<1x8x2x32xf32, #tpu.memory_space<vmem>> -> memref<1x8x2x32xf32, #tpu.memory_space<vmem>>
    %315 = tpu.memref_squeeze %314 : memref<1x8x2x32xf32, #tpu.memory_space<vmem>> -> memref<8x2x32xf32, #tpu.memory_space<vmem>>
    %316 = arith.index_cast %c5_i32 : i32 to index
    %c0_121 = arith.constant 0 : index
    %c0_122 = arith.constant 0 : index
    %317 = vector.load %315[%316, %c0_121, %c0_122] : memref<8x2x32xf32, #tpu.memory_space<vmem>>, vector<1x2x32xf32>
    %318 = vector.shape_cast %317 : vector<1x2x32xf32> to vector<2x32xf32>
    %319 = arith.subf %313, %318 : vector<2x32xf32>
    %c0_i32_123 = arith.constant 0 : i32
    %c0_i32_124 = arith.constant 0 : i32
    %c0_i32_125 = arith.constant 0 : i32
    %320 = tpu.memref_slice %arg3[%c0_i32_26, %c0_i32_123, %c0_i32_124, %c0_i32_125] : memref<1x8x2x32xf32, #tpu.memory_space<vmem>> -> memref<1x8x2x32xf32, #tpu.memory_space<vmem>>
    %321 = tpu.memref_squeeze %320 : memref<1x8x2x32xf32, #tpu.memory_space<vmem>> -> memref<8x2x32xf32, #tpu.memory_space<vmem>>
    %322 = arith.index_cast %c5_i32 : i32 to index
    %c0_126 = arith.constant 0 : index
    %c0_127 = arith.constant 0 : index
    %323 = vector.load %321[%322, %c0_126, %c0_127] : memref<8x2x32xf32, #tpu.memory_space<vmem>>, vector<1x2x32xf32>
    %324 = vector.shape_cast %323 : vector<1x2x32xf32> to vector<2x32xf32>
    %325 = arith.mulf %319, %324 : vector<2x32xf32>
    %326 = arith.addf %318, %325 : vector<2x32xf32>
    %327 = arith.index_cast %c5_i32 : i32 to index
    %c0_128 = arith.constant 0 : index
    %c0_129 = arith.constant 0 : index
    %328 = vector.load %arg15[%327, %c0_128, %c0_129] : memref<8x2x32xf32, #tpu.memory_space<vmem>>, vector<1x2x32xf32>
    %329 = vector.shape_cast %328 : vector<1x2x32xf32> to vector<2x32xf32>
    %330 = vector.shape_cast %326 : vector<2x32xf32> to vector<1x2x32xf32>
    tpu.vector_store %arg15[%327, %c0_128, %c0_129], %330 {strides = array<i32>} : memref<8x2x32xf32, #tpu.memory_space<vmem>>, vector<1x2x32xf32>,
    %c6_i32 = arith.constant 6 : i32
    %331 = arith.index_cast %c6_i32 : i32 to index
    %c0_130 = arith.constant 0 : index
    %c0_131 = arith.constant 0 : index
    %332 = vector.load %arg1[%331, %c0_130, %c0_131] : memref<8x2x32xf32, #tpu.memory_space<vmem>>, vector<1x2x32xf32>
    %333 = vector.shape_cast %332 : vector<1x2x32xf32> to vector<2x32xf32>
    %334 = arith.mulf %333, %3 : vector<2x32xf32>
    %335 = arith.addf %334, %27 : vector<2x32xf32>
    %336 = arith.mulf %326, %15 : vector<2x32xf32>
    %337 = arith.addf %335, %336 : vector<2x32xf32>
    %338 = arith.negf %337 : vector<2x32xf32>
    %339 = math.exp %338 : vector<2x32xf32>
    %cst_132 = arith.constant 1.000000e+00 : f32
    %340 = vector.broadcast %cst_132 : f32 to vector<2x32xf32>
    %341 = arith.addf %340, %339 : vector<2x32xf32>
    %342 = arith.divf %340, %341 : vector<2x32xf32>
    %343 = arith.mulf %333, %7 : vector<2x32xf32>
    %344 = arith.addf %343, %31 : vector<2x32xf32>
    %345 = arith.mulf %326, %19 : vector<2x32xf32>
    %346 = arith.addf %344, %345 : vector<2x32xf32>
    %347 = arith.negf %346 : vector<2x32xf32>
    %348 = math.exp %347 : vector<2x32xf32>
    %cst_133 = arith.constant 1.000000e+00 : f32
    %349 = vector.broadcast %cst_133 : f32 to vector<2x32xf32>
    %350 = arith.addf %349, %348 : vector<2x32xf32>
    %351 = arith.divf %349, %350 : vector<2x32xf32>
    %352 = arith.mulf %333, %11 : vector<2x32xf32>
    %353 = arith.addf %352, %35 : vector<2x32xf32>
    %354 = arith.mulf %326, %342 : vector<2x32xf32>
    %355 = arith.mulf %354, %23 : vector<2x32xf32>
    %356 = arith.addf %353, %355 : vector<2x32xf32>
    %357 = math.tanh %356 : vector<2x32xf32>
    %cst_134 = arith.constant 1.000000e+00 : f32
    %358 = vector.broadcast %cst_134 : f32 to vector<2x32xf32>
    %359 = arith.subf %358, %351 : vector<2x32xf32>
    %360 = arith.mulf %359, %326 : vector<2x32xf32>
    %361 = arith.mulf %351, %357 : vector<2x32xf32>
    %362 = arith.addf %360, %361 : vector<2x32xf32>
    %c0_i32_135 = arith.constant 0 : i32
    %c0_i32_136 = arith.constant 0 : i32
    %c0_i32_137 = arith.constant 0 : i32
    %363 = tpu.memref_slice %arg2[%c0_i32, %c0_i32_135, %c0_i32_136, %c0_i32_137] : memref<1x8x2x32xf32, #tpu.memory_space<vmem>> -> memref<1x8x2x32xf32, #tpu.memory_space<vmem>>
    %364 = tpu.memref_squeeze %363 : memref<1x8x2x32xf32, #tpu.memory_space<vmem>> -> memref<8x2x32xf32, #tpu.memory_space<vmem>>
    %365 = arith.index_cast %c6_i32 : i32 to index
    %c0_138 = arith.constant 0 : index
    %c0_139 = arith.constant 0 : index
    %366 = vector.load %364[%365, %c0_138, %c0_139] : memref<8x2x32xf32, #tpu.memory_space<vmem>>, vector<1x2x32xf32>
    %367 = vector.shape_cast %366 : vector<1x2x32xf32> to vector<2x32xf32>
    %368 = arith.subf %362, %367 : vector<2x32xf32>
    %c0_i32_140 = arith.constant 0 : i32
    %c0_i32_141 = arith.constant 0 : i32
    %c0_i32_142 = arith.constant 0 : i32
    %369 = tpu.memref_slice %arg3[%c0_i32_26, %c0_i32_140, %c0_i32_141, %c0_i32_142] : memref<1x8x2x32xf32, #tpu.memory_space<vmem>> -> memref<1x8x2x32xf32, #tpu.memory_space<vmem>>
    %370 = tpu.memref_squeeze %369 : memref<1x8x2x32xf32, #tpu.memory_space<vmem>> -> memref<8x2x32xf32, #tpu.memory_space<vmem>>
    %371 = arith.index_cast %c6_i32 : i32 to index
    %c0_143 = arith.constant 0 : index
    %c0_144 = arith.constant 0 : index
    %372 = vector.load %370[%371, %c0_143, %c0_144] : memref<8x2x32xf32, #tpu.memory_space<vmem>>, vector<1x2x32xf32>
    %373 = vector.shape_cast %372 : vector<1x2x32xf32> to vector<2x32xf32>
    %374 = arith.mulf %368, %373 : vector<2x32xf32>
    %375 = arith.addf %367, %374 : vector<2x32xf32>
    %376 = arith.index_cast %c6_i32 : i32 to index
    %c0_145 = arith.constant 0 : index
    %c0_146 = arith.constant 0 : index
    %377 = vector.load %arg15[%376, %c0_145, %c0_146] : memref<8x2x32xf32, #tpu.memory_space<vmem>>, vector<1x2x32xf32>
    %378 = vector.shape_cast %377 : vector<1x2x32xf32> to vector<2x32xf32>
    %379 = vector.shape_cast %375 : vector<2x32xf32> to vector<1x2x32xf32>
    tpu.vector_store %arg15[%376, %c0_145, %c0_146], %379 {strides = array<i32>} : memref<8x2x32xf32, #tpu.memory_space<vmem>>, vector<1x2x32xf32>,
    %c7_i32 = arith.constant 7 : i32
    %380 = arith.index_cast %c7_i32 : i32 to index
    %c0_147 = arith.constant 0 : index
    %c0_148 = arith.constant 0 : index
    %381 = vector.load %arg1[%380, %c0_147, %c0_148] : memref<8x2x32xf32, #tpu.memory_space<vmem>>, vector<1x2x32xf32>
    %382 = vector.shape_cast %381 : vector<1x2x32xf32> to vector<2x32xf32>
    %383 = arith.mulf %382, %3 : vector<2x32xf32>
    %384 = arith.addf %383, %27 : vector<2x32xf32>
    %385 = arith.mulf %375, %15 : vector<2x32xf32>
    %386 = arith.addf %384, %385 : vector<2x32xf32>
    %387 = arith.negf %386 : vector<2x32xf32>
    %388 = math.exp %387 : vector<2x32xf32>
    %cst_149 = arith.constant 1.000000e+00 : f32
    %389 = vector.broadcast %cst_149 : f32 to vector<2x32xf32>
    %390 = arith.addf %389, %388 : vector<2x32xf32>
    %391 = arith.divf %389, %390 : vector<2x32xf32>
    %392 = arith.mulf %382, %7 : vector<2x32xf32>
    %393 = arith.addf %392, %31 : vector<2x32xf32>
    %394 = arith.mulf %375, %19 : vector<2x32xf32>
    %395 = arith.addf %393, %394 : vector<2x32xf32>
    %396 = arith.negf %395 : vector<2x32xf32>
    %397 = math.exp %396 : vector<2x32xf32>
    %cst_150 = arith.constant 1.000000e+00 : f32
    %398 = vector.broadcast %cst_150 : f32 to vector<2x32xf32>
    %399 = arith.addf %398, %397 : vector<2x32xf32>
    %400 = arith.divf %398, %399 : vector<2x32xf32>
    %401 = arith.mulf %382, %11 : vector<2x32xf32>
    %402 = arith.addf %401, %35 : vector<2x32xf32>
    %403 = arith.mulf %375, %391 : vector<2x32xf32>
    %404 = arith.mulf %403, %23 : vector<2x32xf32>
    %405 = arith.addf %402, %404 : vector<2x32xf32>
    %406 = math.tanh %405 : vector<2x32xf32>
    %cst_151 = arith.constant 1.000000e+00 : f32
    %407 = vector.broadcast %cst_151 : f32 to vector<2x32xf32>
    %408 = arith.subf %407, %400 : vector<2x32xf32>
    %409 = arith.mulf %408, %375 : vector<2x32xf32>
    %410 = arith.mulf %400, %406 : vector<2x32xf32>
    %411 = arith.addf %409, %410 : vector<2x32xf32>
    %c0_i32_152 = arith.constant 0 : i32
    %c0_i32_153 = arith.constant 0 : i32
    %c0_i32_154 = arith.constant 0 : i32
    %412 = tpu.memref_slice %arg2[%c0_i32, %c0_i32_152, %c0_i32_153, %c0_i32_154] : memref<1x8x2x32xf32, #tpu.memory_space<vmem>> -> memref<1x8x2x32xf32, #tpu.memory_space<vmem>>
    %413 = tpu.memref_squeeze %412 : memref<1x8x2x32xf32, #tpu.memory_space<vmem>> -> memref<8x2x32xf32, #tpu.memory_space<vmem>>
    %414 = arith.index_cast %c7_i32 : i32 to index
    %c0_155 = arith.constant 0 : index
    %c0_156 = arith.constant 0 : index
    %415 = vector.load %413[%414, %c0_155, %c0_156] : memref<8x2x32xf32, #tpu.memory_space<vmem>>, vector<1x2x32xf32>
    %416 = vector.shape_cast %415 : vector<1x2x32xf32> to vector<2x32xf32>
    %417 = arith.subf %411, %416 : vector<2x32xf32>
    %c0_i32_157 = arith.constant 0 : i32
    %c0_i32_158 = arith.constant 0 : i32
    %c0_i32_159 = arith.constant 0 : i32
    %418 = tpu.memref_slice %arg3[%c0_i32_26, %c0_i32_157, %c0_i32_158, %c0_i32_159] : memref<1x8x2x32xf32, #tpu.memory_space<vmem>> -> memref<1x8x2x32xf32, #tpu.memory_space<vmem>>
    %419 = tpu.memref_squeeze %418 : memref<1x8x2x32xf32, #tpu.memory_space<vmem>> -> memref<8x2x32xf32, #tpu.memory_space<vmem>>
    %420 = arith.index_cast %c7_i32 : i32 to index
    %c0_160 = arith.constant 0 : index
    %c0_161 = arith.constant 0 : index
    %421 = vector.load %419[%420, %c0_160, %c0_161] : memref<8x2x32xf32, #tpu.memory_space<vmem>>, vector<1x2x32xf32>
    %422 = vector.shape_cast %421 : vector<1x2x32xf32> to vector<2x32xf32>
    %423 = arith.mulf %417, %422 : vector<2x32xf32>
    %424 = arith.addf %416, %423 : vector<2x32xf32>
    %425 = arith.index_cast %c7_i32 : i32 to index
    %c0_162 = arith.constant 0 : index
    %c0_163 = arith.constant 0 : index
    %426 = vector.load %arg15[%425, %c0_162, %c0_163] : memref<8x2x32xf32, #tpu.memory_space<vmem>>, vector<1x2x32xf32>
    %427 = vector.shape_cast %426 : vector<1x2x32xf32> to vector<2x32xf32>
    %428 = vector.shape_cast %424 : vector<2x32xf32> to vector<1x2x32xf32>
    tpu.vector_store %arg15[%425, %c0_162, %c0_163], %428 {strides = array<i32>} : memref<8x2x32xf32, #tpu.memory_space<vmem>>, vector<1x2x32xf32>,
    %c8_i32 = arith.constant 8 : i32
    %c0_164 = arith.constant 0 : index
    %c0_165 = arith.constant 0 : index
    %429 = vector.load %arg13[%c0_164, %c0_165] : memref<32x2xf32, #tpu.memory_space<vmem>>, vector<32x2xf32>
    %cst_166 = arith.constant dense<0.000000e+00> : vector<2x2xf32>
    %430 = tpu.matmul %424, %429, %cst_166 {dimension_numbers = #tpu.dot_dimension_numbers<[1], [0], [0], [1], [0, 0, 1, 1], [], []>} : vector<2x32xf32>, vector<32x2xf32>, vector<2x2xf32> -> vector<2x2xf32>
    %c0_167 = arith.constant 0 : index
    %c0_168 = arith.constant 0 : index
    %431 = vector.load %arg14[%c0_167, %c0_168] : memref<1x2xf32, #tpu.memory_space<vmem>>, vector<1x2xf32>
    %432 = vector.broadcast %431 : vector<1x2xf32> to vector<2x2xf32>
    %433 = arith.addf %430, %432 : vector<2x2xf32>
    %c0_169 = arith.constant 0 : index
    %c0_170 = arith.constant 0 : index
    %434 = vector.load %arg16[%c0_169, %c0_170] : memref<2x2xf32, #tpu.memory_space<vmem>>, vector<2x2xf32>
    tpu.vector_store %arg16[%c0_169, %c0_170], %433 {strides = array<i32>} : memref<2x2xf32, #tpu.memory_space<vmem>>, vector<2x2xf32>,
    return
  }
  func.func @transform_0(%arg0: i32) -> (i32, i32, i32) {
    %c0_i32 = arith.constant 0 : i32
    %c0_i32_0 = arith.constant 0 : i32
    %c0_i32_1 = arith.constant 0 : i32
    %c0_i32_2 = arith.constant 0 : i32
    return %c0_i32, %c0_i32_0, %c0_i32_1 : i32, i32, i32
  }
  func.func @transform_1(%arg0: i32) -> (i32, i32, i32, i32) {
    %c0_i32 = arith.constant 0 : i32
    %c0_i32_0 = arith.constant 0 : i32
    %c0_i32_1 = arith.constant 0 : i32
    %c0_i32_2 = arith.constant 0 : i32
    %c0_i32_3 = arith.constant 0 : i32
    return %c0_i32, %c0_i32_0, %c0_i32_1, %c0_i32_2 : i32, i32, i32, i32
  }
  func.func @transform_2(%arg0: i32) -> (i32, i32, i32, i32) {
    %c0_i32 = arith.constant 0 : i32
    %c0_i32_0 = arith.constant 0 : i32
    %c0_i32_1 = arith.constant 0 : i32
    %c0_i32_2 = arith.constant 0 : i32
    %c0_i32_3 = arith.constant 0 : i32
    return %c0_i32, %c0_i32_0, %c0_i32_1, %c0_i32_2 : i32, i32, i32, i32
  }
  func.func @transform_3(%arg0: i32) -> (i32, i32, i32) {
    %c0_i32 = arith.constant 0 : i32
    %c0_i32_0 = arith.constant 0 : i32
    %c0_i32_1 = arith.constant 0 : i32
    %c0_i32_2 = arith.constant 0 : i32
    return %c0_i32, %c0_i32_0, %c0_i32_1 : i32, i32, i32
  }
  func.func @transform_4(%arg0: i32) -> (i32, i32, i32) {
    %c0_i32 = arith.constant 0 : i32
    %c0_i32_0 = arith.constant 0 : i32
    %c0_i32_1 = arith.constant 0 : i32
    %c0_i32_2 = arith.constant 0 : i32
    return %c0_i32, %c0_i32_0, %c0_i32_1 : i32, i32, i32
  }
  func.func @transform_5(%arg0: i32) -> (i32, i32, i32) {
    %c0_i32 = arith.constant 0 : i32
    %c0_i32_0 = arith.constant 0 : i32
    %c0_i32_1 = arith.constant 0 : i32
    %c0_i32_2 = arith.constant 0 : i32
    return %c0_i32, %c0_i32_0, %c0_i32_1 : i32, i32, i32
  }
  func.func @transform_6(%arg0: i32) -> (i32, i32, i32) {
    %c0_i32 = arith.constant 0 : i32
    %c0_i32_0 = arith.constant 0 : i32
    %c0_i32_1 = arith.constant 0 : i32
    %c0_i32_2 = arith.constant 0 : i32
    return %c0_i32, %c0_i32_0, %c0_i32_1 : i32, i32, i32
  }
  func.func @transform_7(%arg0: i32) -> (i32, i32, i32) {
    %c0_i32 = arith.constant 0 : i32
    %c0_i32_0 = arith.constant 0 : i32
    %c0_i32_1 = arith.constant 0 : i32
    %c0_i32_2 = arith.constant 0 : i32
    return %c0_i32, %c0_i32_0, %c0_i32_1 : i32, i32, i32
  }
  func.func @transform_8(%arg0: i32) -> (i32, i32, i32) {
    %c0_i32 = arith.constant 0 : i32
    %c0_i32_0 = arith.constant 0 : i32
    %c0_i32_1 = arith.constant 0 : i32
    %c0_i32_2 = arith.constant 0 : i32
    return %c0_i32, %c0_i32_0, %c0_i32_1 : i32, i32, i32
  }
  func.func @transform_9(%arg0: i32) -> (i32, i32, i32) {
    %c0_i32 = arith.constant 0 : i32
    %c0_i32_0 = arith.constant 0 : i32
    %c0_i32_1 = arith.constant 0 : i32
    %c0_i32_2 = arith.constant 0 : i32
    return %c0_i32, %c0_i32_0, %c0_i32_1 : i32, i32, i32
  }
  func.func @transform_10(%arg0: i32) -> (i32, i32, i32) {
    %c0_i32 = arith.constant 0 : i32
    %c0_i32_0 = arith.constant 0 : i32
    %c0_i32_1 = arith.constant 0 : i32
    %c0_i32_2 = arith.constant 0 : i32
    return %c0_i32, %c0_i32_0, %c0_i32_1 : i32, i32, i32
  }
  func.func @transform_11(%arg0: i32) -> (i32, i32, i32) {
    %c0_i32 = arith.constant 0 : i32
    %c0_i32_0 = arith.constant 0 : i32
    %c0_i32_1 = arith.constant 0 : i32
    %c0_i32_2 = arith.constant 0 : i32
    return %c0_i32, %c0_i32_0, %c0_i32_1 : i32, i32, i32
  }
  func.func @transform_12(%arg0: i32) -> (i32, i32) {
    %c0_i32 = arith.constant 0 : i32
    %c0_i32_0 = arith.constant 0 : i32
    %c0_i32_1 = arith.constant 0 : i32
    return %c0_i32, %c0_i32_0 : i32, i32
  }
  func.func @transform_13(%arg0: i32) -> (i32, i32) {
    %c0_i32 = arith.constant 0 : i32
    %c0_i32_0 = arith.constant 0 : i32
    %c0_i32_1 = arith.constant 0 : i32
    return %c0_i32, %c0_i32_0 : i32, i32
  }
  func.func @transform_14(%arg0: i32) -> (i32, i32, i32) {
    %c0_i32 = arith.constant 0 : i32
    %c0_i32_0 = arith.constant 0 : i32
    %c0_i32_1 = arith.constant 0 : i32
    %c0_i32_2 = arith.constant 0 : i32
    return %c0_i32, %c0_i32_0, %c0_i32_1 : i32, i32, i32
  }
  func.func @transform_15(%arg0: i32) -> (i32, i32) {
    %c0_i32 = arith.constant 0 : i32
    %c0_i32_0 = arith.constant 0 : i32
    %c0_i32_1 = arith.constant 0 : i32
    return %c0_i32, %c0_i32_0 : i32, i32
  }
}

</mosaic_0001>

<bundles_post_ra>
// kernel: tpu_custom_call.1
= control target key start
LH: loop header
LB: loop body
LE: loop exit
PB: predicated region body
PF: predicated region fallthrough
CT: control target
= control target key end

     0   :  { %21 = vsyncpa [#allocation3], 0  ;;  %s1203_s0 = inlined_call_operand.vmem [shape: f32[8,2,32], index: 0, kind: input, shape index: {}]   ;;  %s1204_s1 = inlined_call_operand.vmem [shape: f32[1,8,2,32], index: 1, kind: input, shape index: {}]   ;;  %s1205_s2 = inlined_call_operand.hbm [shape: f32[1,8,2,32], index: 2, kind: input, shape index: {}]   ;;  %s1206_s3 = inlined_call_operand.vmem [shape: f32[1,1,32], index: 3, kind: input, shape index: {}]   ;;  %s1207_s4 = inlined_call_operand.vmem [shape: f32[1,1,32], index: 4, kind: input, shape index: {}]   ;;  %s1208_s5 = inlined_call_operand.vmem [shape: f32[1,1,32], index: 5, kind: input, shape index: {}]   ;;  %s1209_s6 = inlined_call_operand.vmem [shape: f32[1,1,32], index: 6, kind: input, shape index: {}]   ;;  %s1210_s7 = inlined_call_operand.vmem [shape: f32[1,1,32], index: 7, kind: input, shape index: {}]   ;;  %s1211_s8 = inlined_call_operand.vmem [shape: f32[1,1,32], index: 8, kind: input, shape index: {}]   ;;  %s1212_s9 = inlined_call_operand.vmem [shape: f32[1,1,32], index: 9, kind: input, shape index: {}]   ;;  %s1213_s10 = inlined_call_operand.vmem [shape: f32[1,1,32], index: 10, kind: input, shape index: {}]   ;;  %s1214_s11 = inlined_call_operand.vmem [shape: f32[1,1,32], index: 11, kind: input, shape index: {}]   ;;  %s1215_s12 = inlined_call_operand.vmem [shape: f32[32,2], index: 12, kind: input, shape index: {}]   ;;  %s1216_s13 = inlined_call_operand.vmem [shape: f32[1,2], index: 13, kind: input, shape index: {}]   ;;  %s1217_s14 = inlined_call_operand.hbm [shape: f32[8,2,32], index: 14, kind: output, shape index: {0}]   ;;  %s1218_s15 = inlined_call_operand.hbm [shape: f32[2,2], index: 15, kind: output, shape index: {1}]  }
   0x1   :  { %22 = vsyncpa [#allocation4], 0 }
   0x2   :  { %23 = vsyncpa [#allocation7], 0  ;;  %s32_s20 = sshll.u32 %s1205_s2, 4  ;;  %s909_s21 = smov [#allocation2]   ;;  %s33_s20 = int_to_ptr.hbm [resolvable:$true] %s32_s20 }
   0x3   :  { %s34_s22 = sshll.u32 %s909_s21, 4  ;;  %s910_s23 = smov 32   ;;  %s35_s22 = int_to_ptr.vmem [resolvable:$true] %s34_s22 }
   0x4   :  { %s911_s24 = smov 2  }
   0x5   :  { %40 = dma.hbm_to_vmem [thread:$0]  %s33_s20, 256, %s35_s22, [#allocation3], %s910_s23, %s910_s23, %s911_s24  }
   0x6   :  { %903 = dma.done.wait [#allocation3], 256  }
   0x7   :  { %904 = vsyncadd [#allocation3], 4294967040  ;;  %v639_v0 = vld [vmem:[%s1215_s12 + $0x18] sm:$0xff]  ;;  %v638_v1 = vld [vmem:[%s1215_s12 + $0x10] sm:$0xff]  ;;  %vm165_vm8 = vcmask 254976   ;;  %s676_s20 = sshll.u32 %s1217_s14, 4  ;;  %s677_s20 = int_to_ptr.hbm [resolvable:$true] %s676_s20 }
   0x8   :  { %660 = vmatpush.msra.mxu0 %v639_v0  ;;  %v637_v2 = vld [vmem:[%s1215_s12 + $0x8] sm:$0xff]  ;;  %v636_v3 = vld [vmem:[%s1215_s12] sm:$0xff]  ;;  %s912_s21 = smov [#allocation5]   ;;  %s913_s26 = smov [#allocation6]  }
   0x9   :  { %v1015_v4 = vld [vmem:[%s1206_s3] ss:$0 sm:$0xff]  ;;  %v707_v59 = vld [vmem:[%s1203_s0 + $0x2] sm:$0x3]  ;;  %s674_s22 = sshll.u32 %s912_s21, 4  ;;  %s688_s12 = sshll.u32 %s913_s26, 4  ;;  %s675_s22 = int_to_ptr.vmem [resolvable:$true] %s674_s22  ;;  %s689_s12 = int_to_ptr.vmem [resolvable:$true] %s688_s12 }
   0xa   :  { %661 = vmatpush.msra.mxu0 %v638_v1  ;;  %v1020_v5 = vld [vmem:[%s1207_s4] ss:$0 sm:$0xff]  ;;  %v169_v63 = vmul.f32 %v1015_v4, %v707_v59  ;;  %s690_s14 = sshll.u32 %s1218_s15, 4  ;;  %s691_s14 = int_to_ptr.hbm [resolvable:$true] %s690_s14 }
   0xb   :  { %v1025_v6 = vld [vmem:[%s1209_s6] ss:$0 sm:$0xff]  ;;  %v192_v0 = vmul.f32 %v1020_v5, %v707_v59 }
   0xc   :  { %v1030_v7 = vld [vmem:[%s1210_s7] ss:$0 sm:$0xff]  ;;  %662 = vmatpush.msra.mxu0 %v637_v2  ;;  %v106_v12 = vmul.f32 0.0, %v1025_v6 }
   0xd   :  { %v1035_v8 = vld [vmem:[%s1212_s9] ss:$0 sm:$0xff]  ;;  %v129_v14 = vmul.f32 0.0, %v1030_v7 }
   0xe   :  { %v1040_v9 = vld [vmem:[%s1213_s10] ss:$0 sm:$0xff]  ;;  %663 = vmatpush.msra.mxu0 %v636_v3  ;;  %v170_v3 = vadd.f32 %v1035_v8, %v169_v63 }
   0xf   :  { %v103_v10 = vld [vmem:[%s1203_s0] sm:$0x3] }
  0x10   :  { %v104_v11 = vmul.f32 %v1015_v4, %v103_v10  ;;  %v127_v13 = vmul.f32 %v1020_v5, %v103_v10  ;;  %v1054_v30 = vld [vmem:[%s1208_s5] ss:$0 sm:$0xff] }
  0x11   :  { %v1063_v38 = vld [vmem:[%s1214_s11] ss:$0 sm:$0xff]  ;;  %v150_v41 = vmul.f32 %v1054_v30, %v103_v10  ;;  %v193_v10 = vadd.f32 %v1040_v9, %v192_v0  ;;  %v215_v35 = vmul.f32 %v1054_v30, %v707_v59 }
  0x12   :  { %v105_v15 = vadd.f32 %v1035_v8, %v104_v11  ;;  %v128_v16 = vadd.f32 %v1040_v9, %v127_v13  ;;  %v1069_v44 = vld [vmem:[%s1211_s8] ss:$0 sm:$0xff] }
  0x13   :  { %v151_v48 = vadd.f32 %v1063_v38, %v150_v41  ;;  %v160_v58 = vld [vmem:[%s1204_s1] sm:$0x3] }
  0x14   :  { %v107_v17 = vadd.f32 %v106_v12, %v105_v15  ;;  %v130_v18 = vadd.f32 %v129_v14, %v128_v16  ;;  %v162_v61 = vld [vmem:[#allocation2] sm:$0x3] }
  0x16   :  { %v705_v19 = vmul.f32 -1.442695, %v107_v17  ;;  %v706_v20 = vmul.f32 -1.442695, %v130_v18 }
  0x18   :  { %751 = vpow2.f32 %v705_v19 }
  0x19   :  { %753 = vpow2.f32 %v706_v20 }
  0x1e   :  { %v752_v21 = vpop.eup %751 }
  0x1f   :  { %v754_v22 = vpop.eup %753  ;;  %v111_v23 = vadd.f32 1.0, %v752_v21 }
  0x20   :  { %v134_v24 = vadd.f32 1.0, %v754_v22 }
  0x21   :  { %755 = vrcp.f32 %v111_v23  ;;  %v123_v28 = vand.u32 2147483648, %v111_v23  ;;  %vm117_vm0 = vweird.f32 %v111_v23  ;;  %v121_v32 = vand.u32 2147483647, %v111_v23 }
  0x22   :  { %757 = vrcp.f32 %v134_v24  ;;  %vm140_vm3 = vweird.f32 %v134_v24  ;;  %v146_v40 = vand.u32 2147483648, %v134_v24  ;;  %v144_v43 = vand.u32 2147483647, %v134_v24 }
  0x23   :  { %v124_v36 = vor.u32 1.1754944e-38, %v123_v28  ;;  %vm122_vm5 = vcmp.eq.f32.partialorder %v121_v32, 8.507059e+37 }
  0x24   :  { %v147_v47 = vor.u32 1.1754944e-38, %v146_v40  ;;  %vm145_vm7 = vcmp.eq.f32.partialorder %v144_v43, 8.507059e+37 }
  0x27   :  { %v756_v25 = vpop.eup %755 }
  0x28   :  { %v758_v26 = vpop.eup %757  ;;  %v113_v27 = vmul.f32 %v756_v25, %v111_v23  ;;  %vm118_vm1 = vweird.f32 %v756_v25 }
  0x29   :  { %v136_v29 = vmul.f32 %v758_v26, %v134_v24  ;;  %vm1056_vm2 = vmor %vm117_vm0, %vm118_vm1  ;;  %vm141_vm4 = vweird.f32 %v758_v26 }
  0x2a   :  { %v114_v31 = vsub.f32 1.0, %v113_v27  ;;  %vm142_vm6 = vmor %vm140_vm3, %vm141_vm4 }
  0x2b   :  { %v137_v33 = vsub.f32 1.0, %v136_v29 }
  0x2c   :  { %v115_v34 = vmul.f32 %v756_v25, %v114_v31 }
  0x2d   :  { %v138_v37 = vmul.f32 %v758_v26, %v137_v33 }
  0x2e   :  { %v116_v39 = vadd.f32 %v756_v25, %v115_v34 }
  0x2f   :  { %v139_v42 = vadd.f32 %v758_v26, %v138_v37 }
  0x30   :  { %v120_v45 = vsel %vm1056_vm2, %v756_v25, %v116_v39 }
  0x31   :  { %v125_v46 = vsel %vm122_vm5, %v124_v36, %v120_v45  ;;  %v143_v50 = vsel %vm142_vm6, %v758_v26, %v139_v42  ;;  %v216_v42 = vadd.f32 %v1063_v38, %v215_v35 }
  0x32   :  { %v152_v49 = vmul.f32 0.0, %v125_v46  ;;  %v148_v52 = vsel %vm145_vm7, %v147_v47, %v143_v50 }
  0x33   :  { %v156_v54 = vsub.f32 1.0, %v148_v52 }
  0x34   :  { %v153_v51 = vmul.f32 %v1069_v44, %v152_v49 }
  0x35   :  { %v157_v55 = vmul.f32 0.0, %v156_v54  ;;  %v711_v54 = vld [vmem:[%s1203_s0 + $0x4] sm:$0x3] }
  0x36   :  { %v154_v53 = vadd.f32 %v153_v51, %v151_v48  ;;  %v259_v59 = vmul.f32 %v1020_v5, %v711_v54 }
  0x38   :  { %759 = vtanh.f32 %v154_v53  ;;  %v710_v53 = vld [vmem:[%s1204_s1 + $0x2] sm:$0x3]  ;;  %v260_v63 = vadd.f32 %v1040_v9, %v259_v59 }
  0x3e   :  { %v760_v56 = vpop.eup %759 }
  0x3f   :  { %v158_v57 = vmul.f32 %v760_v56, %v148_v52  ;;  %v229_v56 = vld [vmem:[#allocation2 + $0x2] sm:$0x3] }
  0x41   :  { %v159_v60 = vadd.f32 %v158_v57, %v157_v55 }
  0x43   :  { %v161_v62 = vsub.f32 %v159_v60, %v160_v58 }
  0x45   :  { %v163_v1 = vmul.f32 %v162_v61, %v161_v62 }
  0x47   :  { %v164_v2 = vadd.f32 %v163_v1, %v160_v58  ;;  %v236_v58 = vmul.f32 %v1015_v4, %v711_v54 }
  0x49   :  { %v171_v11 = vmul.f32 %v1025_v6, %v164_v2  ;;  %v194_v12 = vmul.f32 %v1030_v7, %v164_v2  ;;  %166 = vst.msk [vmem:[#allocation5] sm:$0x3] %vm165_vm8, %v164_v2  ;;  %v237_v62 = vadd.f32 %v1035_v8, %v236_v58 }
  0x4b   :  { %v172_v13 = vadd.f32 %v171_v11, %v170_v3  ;;  %v195_v14 = vadd.f32 %v194_v12, %v193_v10 }
  0x4d   :  { %v708_v15 = vmul.f32 -1.442695, %v172_v13  ;;  %v709_v16 = vmul.f32 -1.442695, %v195_v14 }
  0x4f   :  { %761 = vpow2.f32 %v708_v15 }
  0x50   :  { %763 = vpow2.f32 %v709_v16 }
  0x55   :  { %v762_v17 = vpop.eup %761 }
  0x56   :  { %v764_v18 = vpop.eup %763  ;;  %v176_v19 = vadd.f32 1.0, %v762_v17 }
  0x57   :  { %v199_v20 = vadd.f32 1.0, %v764_v18 }
  0x58   :  { %765 = vrcp.f32 %v176_v19  ;;  %v188_v24 = vand.u32 2147483648, %v176_v19  ;;  %vm182_vm9 = vweird.f32 %v176_v19  ;;  %v186_v27 = vand.u32 2147483647, %v176_v19 }
  0x59   :  { %767 = vrcp.f32 %v199_v20  ;;  %vm205_vm12 = vweird.f32 %v199_v20  ;;  %v211_v34 = vand.u32 2147483648, %v199_v20  ;;  %v209_v37 = vand.u32 2147483647, %v199_v20 }
  0x5a   :  { %v189_v31 = vor.u32 1.1754944e-38, %v188_v24  ;;  %vm187_vm14 = vcmp.eq.f32.partialorder %v186_v27, 8.507059e+37 }
  0x5b   :  { %v212_v41 = vor.u32 1.1754944e-38, %v211_v34  ;;  %vm210_vm0 = vcmp.eq.f32.partialorder %v209_v37, 8.507059e+37 }
  0x5e   :  { %v766_v21 = vpop.eup %765 }
  0x5f   :  { %v768_v22 = vpop.eup %767  ;;  %v178_v23 = vmul.f32 %v766_v21, %v176_v19  ;;  %vm183_vm10 = vweird.f32 %v766_v21 }
  0x60   :  { %v201_v25 = vmul.f32 %v768_v22, %v199_v20  ;;  %vm184_vm11 = vmor %vm182_vm9, %vm183_vm10  ;;  %vm206_vm13 = vweird.f32 %v768_v22 }
  0x61   :  { %v179_v26 = vsub.f32 1.0, %v178_v23  ;;  %vm207_vm15 = vmor %vm205_vm12, %vm206_vm13 }
  0x62   :  { %v202_v28 = vsub.f32 1.0, %v201_v25 }
  0x63   :  { %v180_v29 = vmul.f32 %v766_v21, %v179_v26 }
  0x64   :  { %v203_v32 = vmul.f32 %v768_v22, %v202_v28 }
  0x65   :  { %v181_v33 = vadd.f32 %v766_v21, %v180_v29  ;;  %v282_v29 = vmul.f32 %v1054_v30, %v711_v54 }
  0x66   :  { %v204_v36 = vadd.f32 %v768_v22, %v203_v32 }
  0x67   :  { %v185_v39 = vsel %vm184_vm11, %v766_v21, %v181_v33 }
  0x68   :  { %v190_v40 = vsel %vm187_vm14, %v189_v31, %v185_v39  ;;  %v208_v45 = vsel %vm207_vm15, %v768_v22, %v204_v36  ;;  %v283_v36 = vadd.f32 %v1063_v38, %v282_v29 }
  0x69   :  { %v217_v43 = vmul.f32 %v190_v40, %v164_v2  ;;  %v213_v47 = vsel %vm210_vm0, %v212_v41, %v208_v45 }
  0x6a   :  { %v221_v49 = vsub.f32 1.0, %v213_v47 }
  0x6b   :  { %v218_v46 = vmul.f32 %v1069_v44, %v217_v43 }
  0x6c   :  { %v222_v50 = vmul.f32 %v221_v49, %v164_v2  ;;  %v715_v49 = vld [vmem:[%s1203_s0 + $0x6] sm:$0x3] }
  0x6d   :  { %v219_v48 = vadd.f32 %v218_v46, %v216_v42  ;;  %v326_v54 = vmul.f32 %v1020_v5, %v715_v49 }
  0x6f   :  { %769 = vtanh.f32 %v219_v48  ;;  %v714_v48 = vld [vmem:[%s1204_s1 + $0x4] sm:$0x3]  ;;  %v327_v58 = vadd.f32 %v1040_v9, %v326_v54 }
  0x75   :  { %v770_v51 = vpop.eup %769 }
  0x76   :  { %v223_v52 = vmul.f32 %v770_v51, %v213_v47  ;;  %v296_v51 = vld [vmem:[#allocation2 + $0x4] sm:$0x3] }
  0x78   :  { %v224_v55 = vadd.f32 %v223_v52, %v222_v50 }
  0x7a   :  { %v227_v57 = vsub.f32 %v224_v55, %v710_v53 }
  0x7c   :  { %v230_v60 = vmul.f32 %v229_v56, %v227_v57 }
  0x7e   :  { %v231_v61 = vadd.f32 %v710_v53, %v230_v60  ;;  %v303_v53 = vmul.f32 %v1015_v4, %v715_v49 }
  0x80   :  { %v238_v0 = vmul.f32 %v1025_v6, %v231_v61  ;;  %v261_v1 = vmul.f32 %v1030_v7, %v231_v61  ;;  %233 = vst.msk [vmem:[#allocation5 + $0x2] sm:$0x3] %vm165_vm8, %v231_v61  ;;  %v304_v57 = vadd.f32 %v1035_v8, %v303_v53 }
  0x82   :  { %v239_v2 = vadd.f32 %v238_v0, %v237_v62  ;;  %v262_v3 = vadd.f32 %v261_v1, %v260_v63 }
  0x84   :  { %v712_v10 = vmul.f32 -1.442695, %v239_v2  ;;  %v713_v11 = vmul.f32 -1.442695, %v262_v3 }
  0x86   :  { %771 = vpow2.f32 %v712_v10 }
  0x87   :  { %773 = vpow2.f32 %v713_v11 }
  0x8c   :  { %v772_v12 = vpop.eup %771 }
  0x8d   :  { %v774_v13 = vpop.eup %773  ;;  %v243_v14 = vadd.f32 1.0, %v772_v12 }
  0x8e   :  { %v266_v15 = vadd.f32 1.0, %v774_v13 }
  0x8f   :  { %775 = vrcp.f32 %v243_v14  ;;  %v255_v19 = vand.u32 2147483648, %v243_v14  ;;  %vm249_vm1 = vweird.f32 %v243_v14  ;;  %v253_v22 = vand.u32 2147483647, %v243_v14 }
  0x90   :  { %777 = vrcp.f32 %v266_v15  ;;  %vm272_vm4 = vweird.f32 %v266_v15  ;;  %v278_v28 = vand.u32 2147483648, %v266_v15  ;;  %v276_v32 = vand.u32 2147483647, %v266_v15 }
  0x91   :  { %v256_v25 = vor.u32 1.1754944e-38, %v255_v19  ;;  %vm254_vm6 = vcmp.eq.f32.partialorder %v253_v22, 8.507059e+37 }
  0x92   :  { %v279_v35 = vor.u32 1.1754944e-38, %v278_v28  ;;  %vm277_vm9 = vcmp.eq.f32.partialorder %v276_v32, 8.507059e+37 }
  0x95   :  { %v776_v16 = vpop.eup %775 }
  0x96   :  { %v778_v17 = vpop.eup %777  ;;  %v245_v18 = vmul.f32 %v776_v16, %v243_v14  ;;  %vm250_vm2 = vweird.f32 %v776_v16 }
  0x97   :  { %v268_v20 = vmul.f32 %v778_v17, %v266_v15  ;;  %vm251_vm3 = vmor %vm249_vm1, %vm250_vm2  ;;  %vm273_vm5 = vweird.f32 %v778_v17 }
  0x98   :  { %v246_v21 = vsub.f32 1.0, %v245_v18  ;;  %vm274_vm7 = vmor %vm272_vm4, %vm273_vm5 }
  0x99   :  { %v269_v23 = vsub.f32 1.0, %v268_v20 }
  0x9a   :  { %v247_v24 = vmul.f32 %v776_v16, %v246_v21 }
  0x9b   :  { %v270_v26 = vmul.f32 %v778_v17, %v269_v23 }
  0x9c   :  { %v248_v27 = vadd.f32 %v776_v16, %v247_v24  ;;  %v349_v24 = vmul.f32 %v1054_v30, %v715_v49 }
  0x9d   :  { %v271_v31 = vadd.f32 %v778_v17, %v270_v26 }
  0x9e   :  { %v252_v33 = vsel %vm251_vm3, %v776_v16, %v248_v27 }
  0x9f   :  { %v257_v34 = vsel %vm254_vm6, %v256_v25, %v252_v33  ;;  %v275_v39 = vsel %vm274_vm7, %v778_v17, %v271_v31  ;;  %v350_v31 = vadd.f32 %v1063_v38, %v349_v24 }
  0xa0   :  { %v284_v37 = vmul.f32 %v257_v34, %v231_v61  ;;  %v280_v41 = vsel %vm277_vm9, %v279_v35, %v275_v39 }
  0xa1   :  { %v288_v43 = vsub.f32 1.0, %v280_v41 }
  0xa2   :  { %v285_v40 = vmul.f32 %v1069_v44, %v284_v37 }
  0xa3   :  { %v289_v45 = vmul.f32 %v288_v43, %v231_v61  ;;  %v719_v43 = vld [vmem:[%s1203_s0 + $0x8] sm:$0x3] }
  0xa4   :  { %v286_v42 = vadd.f32 %v285_v40, %v283_v36  ;;  %v393_v49 = vmul.f32 %v1020_v5, %v719_v43 }
  0xa6   :  { %779 = vtanh.f32 %v286_v42  ;;  %v718_v42 = vld [vmem:[%s1204_s1 + $0x6] sm:$0x3]  ;;  %v394_v53 = vadd.f32 %v1040_v9, %v393_v49 }
  0xac   :  { %v780_v46 = vpop.eup %779 }
  0xad   :  { %v290_v47 = vmul.f32 %v780_v46, %v280_v41  ;;  %v363_v46 = vld [vmem:[#allocation2 + $0x6] sm:$0x3] }
  0xaf   :  { %v291_v50 = vadd.f32 %v290_v47, %v289_v45 }
  0xb1   :  { %v294_v52 = vsub.f32 %v291_v50, %v714_v48 }
  0xb3   :  { %v297_v55 = vmul.f32 %v296_v51, %v294_v52 }
  0xb5   :  { %v298_v56 = vadd.f32 %v714_v48, %v297_v55  ;;  %v370_v48 = vmul.f32 %v1015_v4, %v719_v43 }
  0xb7   :  { %v305_v59 = vmul.f32 %v1025_v6, %v298_v56  ;;  %v328_v60 = vmul.f32 %v1030_v7, %v298_v56  ;;  %300 = vst.msk [vmem:[#allocation5 + $0x4] sm:$0x3] %vm165_vm8, %v298_v56  ;;  %v371_v52 = vadd.f32 %v1035_v8, %v370_v48 }
  0xb9   :  { %v306_v61 = vadd.f32 %v305_v59, %v304_v57  ;;  %v329_v62 = vadd.f32 %v328_v60, %v327_v58 }
  0xbb   :  { %v716_v63 = vmul.f32 -1.442695, %v306_v61  ;;  %v717_v0 = vmul.f32 -1.442695, %v329_v62 }
  0xbd   :  { %781 = vpow2.f32 %v716_v63 }
  0xbe   :  { %783 = vpow2.f32 %v717_v0 }
  0xc3   :  { %v782_v1 = vpop.eup %781 }
  0xc4   :  { %v784_v2 = vpop.eup %783  ;;  %v310_v3 = vadd.f32 1.0, %v782_v1 }
  0xc5   :  { %v333_v10 = vadd.f32 1.0, %v784_v2 }
  0xc6   :  { %785 = vrcp.f32 %v310_v3  ;;  %v322_v14 = vand.u32 2147483648, %v310_v3  ;;  %vm316_vm10 = vweird.f32 %v310_v3  ;;  %v320_v17 = vand.u32 2147483647, %v310_v3 }
  0xc7   :  { %787 = vrcp.f32 %v333_v10  ;;  %vm339_vm13 = vweird.f32 %v333_v10  ;;  %v345_v23 = vand.u32 2147483648, %v333_v10  ;;  %v343_v26 = vand.u32 2147483647, %v333_v10 }
  0xc8   :  { %v323_v20 = vor.u32 1.1754944e-38, %v322_v14  ;;  %vm321_vm15 = vcmp.eq.f32.partialorder %v320_v17, 8.507059e+37 }
  0xc9   :  { %v346_v29 = vor.u32 1.1754944e-38, %v345_v23  ;;  %vm344_vm1 = vcmp.eq.f32.partialorder %v343_v26, 8.507059e+37 }
  0xcc   :  { %v786_v11 = vpop.eup %785 }
  0xcd   :  { %v788_v12 = vpop.eup %787  ;;  %v312_v13 = vmul.f32 %v786_v11, %v310_v3  ;;  %vm317_vm11 = vweird.f32 %v786_v11 }
  0xce   :  { %v335_v15 = vmul.f32 %v788_v12, %v333_v10  ;;  %vm318_vm12 = vmor %vm316_vm10, %vm317_vm11  ;;  %vm340_vm14 = vweird.f32 %v788_v12 }
  0xcf   :  { %v313_v16 = vsub.f32 1.0, %v312_v13  ;;  %vm341_vm0 = vmor %vm339_vm13, %vm340_vm14 }
  0xd0   :  { %v336_v18 = vsub.f32 1.0, %v335_v15 }
  0xd1   :  { %v314_v19 = vmul.f32 %v786_v11, %v313_v16 }
  0xd2   :  { %v337_v21 = vmul.f32 %v788_v12, %v336_v18 }
  0xd3   :  { %v315_v22 = vadd.f32 %v786_v11, %v314_v19  ;;  %v416_v19 = vmul.f32 %v1054_v30, %v719_v43 }
  0xd4   :  { %v338_v25 = vadd.f32 %v788_v12, %v337_v21 }
  0xd5   :  { %v319_v27 = vsel %vm318_vm12, %v786_v11, %v315_v22 }
  0xd6   :  { %v324_v28 = vsel %vm321_vm15, %v323_v20, %v319_v27  ;;  %v342_v33 = vsel %vm341_vm0, %v788_v12, %v338_v25  ;;  %v417_v25 = vadd.f32 %v1063_v38, %v416_v19 }
  0xd7   :  { %v351_v32 = vmul.f32 %v324_v28, %v298_v56  ;;  %v347_v35 = vsel %vm344_vm1, %v346_v29, %v342_v33 }
  0xd8   :  { %v355_v37 = vsub.f32 1.0, %v347_v35 }
  0xd9   :  { %v352_v34 = vmul.f32 %v1069_v44, %v351_v32 }
  0xda   :  { %v356_v39 = vmul.f32 %v355_v37, %v298_v56  ;;  %v723_v37 = vld [vmem:[%s1203_s0 + $0xa] sm:$0x3] }
  0xdb   :  { %v353_v36 = vadd.f32 %v352_v34, %v350_v31  ;;  %v460_v43 = vmul.f32 %v1020_v5, %v723_v37 }
  0xdd   :  { %789 = vtanh.f32 %v353_v36  ;;  %v722_v36 = vld [vmem:[%s1204_s1 + $0x8] sm:$0x3]  ;;  %v461_v48 = vadd.f32 %v1040_v9, %v460_v43 }
  0xe3   :  { %v790_v40 = vpop.eup %789 }
  0xe4   :  { %v357_v41 = vmul.f32 %v790_v40, %v347_v35  ;;  %v430_v40 = vld [vmem:[#allocation2 + $0x8] sm:$0x3] }
  0xe6   :  { %v358_v45 = vadd.f32 %v357_v41, %v356_v39 }
  0xe8   :  { %v361_v47 = vsub.f32 %v358_v45, %v718_v42 }
  0xea   :  { %v364_v50 = vmul.f32 %v363_v46, %v361_v47 }
  0xec   :  { %v365_v51 = vadd.f32 %v718_v42, %v364_v50  ;;  %v437_v42 = vmul.f32 %v1015_v4, %v723_v37 }
  0xee   :  { %v372_v54 = vmul.f32 %v1025_v6, %v365_v51  ;;  %v395_v55 = vmul.f32 %v1030_v7, %v365_v51  ;;  %367 = vst.msk [vmem:[#allocation5 + $0x6] sm:$0x3] %vm165_vm8, %v365_v51  ;;  %v438_v47 = vadd.f32 %v1035_v8, %v437_v42 }
  0xf0   :  { %v373_v56 = vadd.f32 %v372_v54, %v371_v52  ;;  %v396_v57 = vadd.f32 %v395_v55, %v394_v53 }
  0xf2   :  { %v720_v58 = vmul.f32 -1.442695, %v373_v56  ;;  %v721_v59 = vmul.f32 -1.442695, %v396_v57 }
  0xf4   :  { %791 = vpow2.f32 %v720_v58 }
  0xf5   :  { %793 = vpow2.f32 %v721_v59 }
  0xfa   :  { %v792_v60 = vpop.eup %791 }
  0xfb   :  { %v794_v61 = vpop.eup %793  ;;  %v377_v62 = vadd.f32 1.0, %v792_v60 }
  0xfc   :  { %v400_v63 = vadd.f32 1.0, %v794_v61 }
  0xfd   :  { %795 = vrcp.f32 %v377_v62  ;;  %v389_v3 = vand.u32 2147483648, %v377_v62  ;;  %vm383_vm2 = vweird.f32 %v377_v62  ;;  %v387_v12 = vand.u32 2147483647, %v377_v62 }
  0xfe   :  { %797 = vrcp.f32 %v400_v63  ;;  %vm406_vm5 = vweird.f32 %v400_v63  ;;  %v412_v18 = vand.u32 2147483648, %v400_v63  ;;  %v410_v21 = vand.u32 2147483647, %v400_v63 }
  0xff   :  { %v390_v15 = vor.u32 1.1754944e-38, %v389_v3  ;;  %vm388_vm7 = vcmp.eq.f32.partialorder %v387_v12, 8.507059e+37 }
 0x100   :  { %v413_v24 = vor.u32 1.1754944e-38, %v412_v18  ;;  %vm411_vm10 = vcmp.eq.f32.partialorder %v410_v21, 8.507059e+37 }
 0x103   :  { %v796_v0 = vpop.eup %795 }
 0x104   :  { %v798_v1 = vpop.eup %797  ;;  %v379_v2 = vmul.f32 %v796_v0, %v377_v62  ;;  %vm384_vm3 = vweird.f32 %v796_v0 }
 0x105   :  { %v402_v10 = vmul.f32 %v798_v1, %v400_v63  ;;  %vm385_vm4 = vmor %vm383_vm2, %vm384_vm3  ;;  %vm407_vm6 = vweird.f32 %v798_v1 }
 0x106   :  { %v380_v11 = vsub.f32 1.0, %v379_v2  ;;  %vm408_vm9 = vmor %vm406_vm5, %vm407_vm6 }
 0x107   :  { %v403_v13 = vsub.f32 1.0, %v402_v10 }
 0x108   :  { %v381_v14 = vmul.f32 %v796_v0, %v380_v11 }
 0x109   :  { %v404_v16 = vmul.f32 %v798_v1, %v403_v13 }
 0x10a   :  { %v382_v17 = vadd.f32 %v796_v0, %v381_v14  ;;  %v483_v14 = vmul.f32 %v1054_v30, %v723_v37 }
 0x10b   :  { %v405_v20 = vadd.f32 %v798_v1, %v404_v16 }
 0x10c   :  { %v386_v22 = vsel %vm385_vm4, %v796_v0, %v382_v17 }
 0x10d   :  { %v391_v23 = vsel %vm388_vm7, %v390_v15, %v386_v22  ;;  %v409_v27 = vsel %vm408_vm9, %v798_v1, %v405_v20  ;;  %v484_v20 = vadd.f32 %v1063_v38, %v483_v14 }
 0x10e   :  { %v418_v26 = vmul.f32 %v391_v23, %v365_v51  ;;  %v414_v29 = vsel %vm411_vm10, %v413_v24, %v409_v27 }
 0x10f   :  { %v422_v32 = vsub.f32 1.0, %v414_v29 }
 0x110   :  { %v419_v28 = vmul.f32 %v1069_v44, %v418_v26 }
 0x111   :  { %v423_v33 = vmul.f32 %v422_v32, %v365_v51  ;;  %v727_v32 = vld [vmem:[%s1203_s0 + $0xc] sm:$0x3] }
 0x112   :  { %v420_v31 = vadd.f32 %v419_v28, %v417_v25  ;;  %v527_v37 = vmul.f32 %v1020_v5, %v727_v32 }
 0x114   :  { %799 = vtanh.f32 %v420_v31  ;;  %v726_v31 = vld [vmem:[%s1204_s1 + $0xa] sm:$0x3]  ;;  %v528_v42 = vadd.f32 %v1040_v9, %v527_v37 }
 0x11a   :  { %v800_v34 = vpop.eup %799 }
 0x11b   :  { %v424_v35 = vmul.f32 %v800_v34, %v414_v29  ;;  %v497_v34 = vld [vmem:[#allocation2 + $0xa] sm:$0x3] }
 0x11d   :  { %v425_v39 = vadd.f32 %v424_v35, %v423_v33 }
 0x11f   :  { %v428_v41 = vsub.f32 %v425_v39, %v722_v36 }
 0x121   :  { %v431_v45 = vmul.f32 %v430_v40, %v428_v41 }
 0x123   :  { %v432_v46 = vadd.f32 %v722_v36, %v431_v45  ;;  %v504_v36 = vmul.f32 %v1015_v4, %v727_v32 }
 0x125   :  { %v439_v49 = vmul.f32 %v1025_v6, %v432_v46  ;;  %v462_v50 = vmul.f32 %v1030_v7, %v432_v46  ;;  %434 = vst.msk [vmem:[#allocation5 + $0x8] sm:$0x3] %vm165_vm8, %v432_v46  ;;  %v505_v41 = vadd.f32 %v1035_v8, %v504_v36 }
 0x127   :  { %v440_v51 = vadd.f32 %v439_v49, %v438_v47  ;;  %v463_v52 = vadd.f32 %v462_v50, %v461_v48 }
 0x129   :  { %v724_v53 = vmul.f32 -1.442695, %v440_v51  ;;  %v725_v54 = vmul.f32 -1.442695, %v463_v52 }
 0x12b   :  { %801 = vpow2.f32 %v724_v53 }
 0x12c   :  { %803 = vpow2.f32 %v725_v54 }
 0x131   :  { %v802_v55 = vpop.eup %801 }
 0x132   :  { %v804_v56 = vpop.eup %803  ;;  %v444_v57 = vadd.f32 1.0, %v802_v55 }
 0x133   :  { %v467_v58 = vadd.f32 1.0, %v804_v56 }
 0x134   :  { %805 = vrcp.f32 %v444_v57  ;;  %v456_v62 = vand.u32 2147483648, %v444_v57  ;;  %vm450_vm11 = vweird.f32 %v444_v57  ;;  %v454_v1 = vand.u32 2147483647, %v444_v57 }
 0x135   :  { %807 = vrcp.f32 %v467_v58  ;;  %vm473_vm14 = vweird.f32 %v467_v58  ;;  %v479_v13 = vand.u32 2147483648, %v467_v58  ;;  %v477_v16 = vand.u32 2147483647, %v467_v58 }
 0x136   :  { %v457_v10 = vor.u32 1.1754944e-38, %v456_v62  ;;  %vm455_vm0 = vcmp.eq.f32.partialorder %v454_v1, 8.507059e+37 }
 0x137   :  { %v480_v19 = vor.u32 1.1754944e-38, %v479_v13  ;;  %vm478_vm2 = vcmp.eq.f32.partialorder %v477_v16, 8.507059e+37 }
 0x13a   :  { %v806_v59 = vpop.eup %805 }
 0x13b   :  { %v808_v60 = vpop.eup %807  ;;  %v446_v61 = vmul.f32 %v806_v59, %v444_v57  ;;  %vm451_vm12 = vweird.f32 %v806_v59 }
 0x13c   :  { %v469_v63 = vmul.f32 %v808_v60, %v467_v58  ;;  %vm452_vm13 = vmor %vm450_vm11, %vm451_vm12  ;;  %vm474_vm15 = vweird.f32 %v808_v60 }
 0x13d   :  { %v447_v0 = vsub.f32 1.0, %v446_v61  ;;  %vm475_vm1 = vmor %vm473_vm14, %vm474_vm15 }
 0x13e   :  { %v470_v2 = vsub.f32 1.0, %v469_v63 }
 0x13f   :  { %v448_v3 = vmul.f32 %v806_v59, %v447_v0 }
 0x140   :  { %v471_v11 = vmul.f32 %v808_v60, %v470_v2 }
 0x141   :  { %v449_v12 = vadd.f32 %v806_v59, %v448_v3  ;;  %v550_v3 = vmul.f32 %v1054_v30, %v727_v32 }
 0x142   :  { %v472_v15 = vadd.f32 %v808_v60, %v471_v11 }
 0x143   :  { %v453_v17 = vsel %vm452_vm13, %v806_v59, %v449_v12 }
 0x144   :  { %v458_v18 = vsel %vm455_vm0, %v457_v10, %v453_v17  ;;  %v476_v22 = vsel %vm475_vm1, %v808_v60, %v472_v15  ;;  %v551_v15 = vadd.f32 %v1063_v38, %v550_v3 }
 0x145   :  { %v485_v21 = vmul.f32 %v458_v18, %v432_v46  ;;  %v481_v24 = vsel %vm478_vm2, %v480_v19, %v476_v22 }
 0x146   :  { %v489_v26 = vsub.f32 1.0, %v481_v24 }
 0x147   :  { %v486_v23 = vmul.f32 %v1069_v44, %v485_v21 }
 0x148   :  { %v490_v27 = vmul.f32 %v489_v26, %v432_v46  ;;  %v731_v26 = vld [vmem:[%s1203_s0 + $0xe] sm:$0x3] }
 0x149   :  { %v487_v25 = vadd.f32 %v486_v23, %v484_v20  ;;  %v594_v32 = vmul.f32 %v1020_v5, %v731_v26 }
 0x14b   :  { %809 = vtanh.f32 %v487_v25  ;;  %v730_v25 = vld [vmem:[%s1204_s1 + $0xc] sm:$0x3]  ;;  %v595_v36 = vadd.f32 %v1040_v9, %v594_v32 }
 0x151   :  { %v810_v28 = vpop.eup %809 }
 0x152   :  { %v491_v29 = vmul.f32 %v810_v28, %v481_v24  ;;  %v564_v28 = vld [vmem:[#allocation2 + $0xc] sm:$0x3] }
 0x154   :  { %v492_v33 = vadd.f32 %v491_v29, %v490_v27 }
 0x156   :  { %v495_v35 = vsub.f32 %v492_v33, %v726_v31 }
 0x158   :  { %v498_v39 = vmul.f32 %v497_v34, %v495_v35 }
 0x15a   :  { %v499_v40 = vadd.f32 %v726_v31, %v498_v39  ;;  %v571_v31 = vmul.f32 %v1015_v4, %v731_v26 }
 0x15c   :  { %v506_v43 = vmul.f32 %v1025_v6, %v499_v40  ;;  %v529_v45 = vmul.f32 %v1030_v7, %v499_v40  ;;  %501 = vst.msk [vmem:[#allocation5 + $0xa] sm:$0x3] %vm165_vm8, %v499_v40  ;;  %v572_v35 = vadd.f32 %v1035_v8, %v571_v31 }
 0x15e   :  { %v507_v46 = vadd.f32 %v506_v43, %v505_v41  ;;  %v530_v47 = vadd.f32 %v529_v45, %v528_v42 }
 0x160   :  { %v728_v48 = vmul.f32 -1.442695, %v507_v46  ;;  %v729_v49 = vmul.f32 -1.442695, %v530_v47 }
 0x162   :  { %811 = vpow2.f32 %v728_v48 }
 0x163   :  { %813 = vpow2.f32 %v729_v49 }
 0x168   :  { %v812_v50 = vpop.eup %811 }
 0x169   :  { %v814_v51 = vpop.eup %813  ;;  %v511_v52 = vadd.f32 1.0, %v812_v50 }
 0x16a   :  { %v534_v53 = vadd.f32 1.0, %v814_v51 }
 0x16b   :  { %815 = vrcp.f32 %v511_v52  ;;  %v523_v57 = vand.u32 2147483648, %v511_v52  ;;  %vm517_vm3 = vweird.f32 %v511_v52  ;;  %v521_v60 = vand.u32 2147483647, %v511_v52 }
 0x16c   :  { %817 = vrcp.f32 %v534_v53  ;;  %vm540_vm6 = vweird.f32 %v534_v53  ;;  %v546_v2 = vand.u32 2147483648, %v534_v53  ;;  %v544_v11 = vand.u32 2147483647, %v534_v53 }
 0x16d   :  { %v524_v63 = vor.u32 1.1754944e-38, %v523_v57  ;;  %vm522_vm9 = vcmp.eq.f32.partialorder %v521_v60, 8.507059e+37 }
 0x16e   :  { %v547_v14 = vor.u32 1.1754944e-38, %v546_v2  ;;  %vm545_vm11 = vcmp.eq.f32.partialorder %v544_v11, 8.507059e+37 }
 0x171   :  { %v816_v54 = vpop.eup %815 }
 0x172   :  { %v818_v55 = vpop.eup %817  ;;  %v513_v56 = vmul.f32 %v816_v54, %v511_v52  ;;  %vm518_vm4 = vweird.f32 %v816_v54 }
 0x173   :  { %v536_v58 = vmul.f32 %v818_v55, %v534_v53  ;;  %vm519_vm5 = vmor %vm517_vm3, %vm518_vm4  ;;  %vm541_vm7 = vweird.f32 %v818_v55  ;;  %vm644_vm4 = vcmask 261120  }
 0x174   :  { %v514_v59 = vsub.f32 1.0, %v513_v56  ;;  %vm542_vm10 = vmor %vm540_vm6, %vm541_vm7  ;;  %v617_v56 = vmul.f32 %v1054_v30, %v731_v26 }
 0x175   :  { %v537_v61 = vsub.f32 1.0, %v536_v58 }
 0x176   :  { %v515_v62 = vmul.f32 %v816_v54, %v514_v59 }
 0x177   :  { %v538_v0 = vmul.f32 %v818_v55, %v537_v61 }
 0x178   :  { %v516_v1 = vadd.f32 %v816_v54, %v515_v62  ;;  %v618_v62 = vadd.f32 %v1063_v38, %v617_v56 }
 0x179   :  { %v539_v10 = vadd.f32 %v818_v55, %v538_v0 }
 0x17a   :  { %v520_v12 = vsel %vm519_vm5, %v816_v54, %v516_v1  ;;  %vm668_vm5 = vcmask 9216  }
 0x17b   :  { %v525_v13 = vsel %vm522_vm9, %v524_v63, %v520_v12  ;;  %v543_v17 = vsel %vm542_vm10, %v818_v55, %v539_v10 }
 0x17c   :  { %v552_v16 = vmul.f32 %v525_v13, %v499_v40  ;;  %v548_v19 = vsel %vm545_vm11, %v547_v14, %v543_v17  ;;  %v734_v13 = vld [vmem:[%s1204_s1 + $0xe] sm:$0x3] }
 0x17d   :  { %v556_v21 = vsub.f32 1.0, %v548_v19 }
 0x17e   :  { %v553_v18 = vmul.f32 %v1069_v44, %v552_v16 }
 0x17f   :  { %v557_v22 = vmul.f32 %v556_v21, %v499_v40 }
 0x180   :  { %v554_v20 = vadd.f32 %v553_v18, %v551_v15  ;;  %v631_v15 = vld [vmem:[#allocation2 + $0xe] sm:$0x3] }
 0x182   :  { %819 = vtanh.f32 %v554_v20 }
 0x188   :  { %v820_v23 = vpop.eup %819 }
 0x189   :  { %v558_v24 = vmul.f32 %v820_v23, %v548_v19 }
 0x18b   :  { %v559_v27 = vadd.f32 %v558_v24, %v557_v22 }
 0x18d   :  { %v562_v29 = vsub.f32 %v559_v27, %v730_v25 }
 0x18f   :  { %v565_v33 = vmul.f32 %v564_v28, %v562_v29 }
 0x191   :  { %v566_v34 = vadd.f32 %v730_v25, %v565_v33 }
 0x193   :  { %v573_v37 = vmul.f32 %v1025_v6, %v566_v34  ;;  %v596_v39 = vmul.f32 %v1030_v7, %v566_v34  ;;  %568 = vst.msk [vmem:[#allocation5 + $0xc] sm:$0x3] %vm165_vm8, %v566_v34 }
 0x195   :  { %v574_v40 = vadd.f32 %v573_v37, %v572_v35  ;;  %v597_v41 = vadd.f32 %v596_v39, %v595_v36 }
 0x197   :  { %v732_v42 = vmul.f32 -1.442695, %v574_v40  ;;  %v733_v43 = vmul.f32 -1.442695, %v597_v41 }
 0x199   :  { %821 = vpow2.f32 %v732_v42 }
 0x19a   :  { %823 = vpow2.f32 %v733_v43 }
 0x19f   :  { %v822_v4 = vpop.eup %821 }
 0x1a0   :  { %v824_v5 = vpop.eup %823  ;;  %v578_v45 = vadd.f32 1.0, %v822_v4 }
 0x1a1   :  { %v601_v46 = vadd.f32 1.0, %v824_v5 }
 0x1a2   :  { %825 = vrcp.f32 %v578_v45  ;;  %v590_v6 = vand.u32 2147483648, %v578_v45  ;;  %vm584_vm12 = vweird.f32 %v578_v45  ;;  %v588_v49 = vand.u32 2147483647, %v578_v45 }
 0x1a3   :  { %827 = vrcp.f32 %v601_v46  ;;  %vm607_vm15 = vweird.f32 %v601_v46  ;;  %v613_v55 = vand.u32 2147483648, %v601_v46  ;;  %v611_v58 = vand.u32 2147483647, %v601_v46 }
 0x1a4   :  { %v591_v52 = vor.u32 1.1754944e-38, %v590_v6  ;;  %vm589_vm1 = vcmp.eq.f32.partialorder %v588_v49, 8.507059e+37 }
 0x1a5   :  { %v614_v61 = vor.u32 1.1754944e-38, %v613_v55  ;;  %vm612_vm3 = vcmp.eq.f32.partialorder %v611_v58, 8.507059e+37 }
 0x1a8   :  { %v826_v8 = vpop.eup %825 }
 0x1a9   :  { %v828_v9 = vpop.eup %827  ;;  %v580_v47 = vmul.f32 %v826_v8, %v578_v45  ;;  %vm585_vm13 = vweird.f32 %v826_v8 }
 0x1aa   :  { %v603_v48 = vmul.f32 %v828_v9, %v601_v46  ;;  %vm586_vm14 = vmor %vm584_vm12, %vm585_vm13  ;;  %vm608_vm0 = vweird.f32 %v828_v9 }
 0x1ab   :  { %v581_v7 = vsub.f32 1.0, %v580_v47  ;;  %vm609_vm2 = vmor %vm607_vm15, %vm608_vm0 }
 0x1ac   :  { %v604_v50 = vsub.f32 1.0, %v603_v48 }
 0x1ad   :  { %v582_v51 = vmul.f32 %v826_v8, %v581_v7 }
 0x1ae   :  { %v605_v53 = vmul.f32 %v828_v9, %v604_v50 }
 0x1af   :  { %v583_v54 = vadd.f32 %v826_v8, %v582_v51 }
 0x1b0   :  { %v606_v57 = vadd.f32 %v828_v9, %v605_v53 }
 0x1b1   :  { %v587_v59 = vsel %vm586_vm14, %v826_v8, %v583_v54 }
 0x1b2   :  { %v592_v60 = vsel %vm589_vm1, %v591_v52, %v587_v59  ;;  %v610_v0 = vsel %vm609_vm2, %v828_v9, %v606_v57 }
 0x1b3   :  { %v619_v63 = vmul.f32 %v592_v60, %v566_v34  ;;  %v615_v2 = vsel %vm612_vm3, %v614_v61, %v610_v0 }
 0x1b4   :  { %v623_v10 = vsub.f32 1.0, %v615_v2 }
 0x1b5   :  { %v620_v1 = vmul.f32 %v1069_v44, %v619_v63  ;;  %v750_v44 = vld [vmem:[%s1216_s13] ss:$0 sm:$0xff] }
 0x1b6   :  { %v624_v11 = vmul.f32 %v623_v10, %v566_v34 }
 0x1b7   :  { %v621_v3 = vadd.f32 %v620_v1, %v618_v62 }
 0x1b9   :  { %829 = vtanh.f32 %v621_v3 }
 0x1bf   :  { %v830_v12 = vpop.eup %829 }
 0x1c0   :  { %v625_v30 = vmul.f32 %v830_v12, %v615_v2 }
 0x1c2   :  { %v626_v14 = vadd.f32 %v625_v30, %v624_v11 }
 0x1c4   :  { %v629_v16 = vsub.f32 %v626_v14, %v734_v13 }
 0x1c6   :  { %v632_v38 = vmul.f32 %v631_v15, %v629_v16 }
 0x1c8   :  { %v633_v17 = vadd.f32 %v734_v13, %v632_v38 }
 0x1ca   :  { %635 = vst.msk [vmem:[#allocation5 + $0xe] sm:$0x3] %vm165_vm8, %v633_v17  ;;  %735 = vmatmul.msk.f32.vlgmr.msra.gmra.mxu0 %vm644_vm4, %v633_v17 }
 0x1cb   :  { %682 = dma.vmem_to_hbm [thread:$0]  %s675_s22, 256, %s677_s20, [#allocation4], %s910_s23, %s910_s23, %s911_s24  }
 0x247   :  { %v665_v18 = vpop.f32.mrf.mxu0 }
 0x248   :  { %v666_v19 = vadd.f32 %v750_v44, %v665_v18 }
 0x24a   :  { %669 = vst.msk [vmem:[#allocation6] sm:$0x3] %vm668_vm5, %v666_v19 }
 0x24b   :  { %693 = dma.vmem_to_hbm [thread:$0]  %s689_s12, 32, %s691_s14, [#allocation7]  }
 0x24c   :  { %905 = dma.done.wait [#allocation4], 256  }
 0x24d   :  { %906 = vsyncadd [#allocation4], 4294967040 }
 0x24e   :  { %907 = dma.done.wait [#allocation7], 32  }
 0x24f   :  { %908 = vsyncadd [#allocation7], 4294967264 }
 0x250   :  { %702 = vsyncpa [#allocation3], 1 }
 0x251   :  { %703 = vsyncpa [#allocation4], 1 }
 0x252   :  { %704 = vsyncpa [#allocation7], 1 }

</bundles_post_ra>
